<compile_context>
chip_gen: v5e
topology: v5e:2x2
jax: 0.10.0
libtpu: 0.0.40
codegen_flags: <defaults>
</compile_context>

<pallas_src>
import functools

import jax
import jax.numpy as jnp
from jax import lax
from jax.experimental import pallas as pl
from jax.experimental.pallas import tpu as pltpu


# ----------------------------------------------------------------------------
# Fused Pallas kernel: t+1 x (conv3x3 + BatchNorm2d(train) + ReLU) with the
# residual adds, entirely VMEM-resident, lane-dense layout (N*C, H*W).
# ----------------------------------------------------------------------------
def _recurrent_block_kernel(x_ref, w_ref, masks_ref, gamma_ref, beta_ref,
                            out_ref, *, width, t, eps):
    # x_ref:     (N*C, H*W)  f32; rows = (image, channel), lanes = flattened H*W
    # w_ref:     (C, 9*C)    conv weights, columns tap-major: [k*C + ci]
    # masks_ref: (9, H*W)    0/1 validity mask per 3x3 tap (implements pad=1)
    # gamma_ref: (C, 1)      BN scale
    # beta_ref:  (C, 1)      BN shift
    # out_ref:   (N*C, H*W)
    NC, HW = x_ref.shape
    C = gamma_ref.shape[0]          # ch_out == ch_in (required by the residual)
    N = NC // C

    x = x_ref[...]                  # (N*C, HW)
    w9 = w_ref[...]                 # (C, 9C)
    masks = masks_ref[...]          # (9, HW)
    gamma = gamma_ref[...]          # (C, 1)
    beta = beta_ref[...]            # (C, 1)
    inv_cnt = 1.0 / float(N * HW)

    taps = [(dy, dx) for dy in (-1, 0, 1) for dx in (-1, 0, 1)]

    def shift_lanes(a, s):
        # a[:, p] -> a[:, p + s] (circular lane rotation with static shift; the
        # wrapped / out-of-image lanes are zeroed by the tap mask afterwards).
        s = s % HW
        if s == 0:
            return a
        return jnp.concatenate([a[:, s:], a[:, :s]], axis=1)

    def conv_bn_relu(cur):
        # cur: (N*C, HW) -> conv3x3(pad=1) + BN(train) + ReLU -> (N*C, HW)
        # Shifted, boundary-masked planes per 3x3 tap; lanes stay fully dense.
        planes = []
        for k, (dy, dx) in enumerate(taps):
            shifted = shift_lanes(cur, dy * width + dx)          # (N*C, HW)
            planes.append(shifted * masks[k:k + 1, :])           # zero padding

        # Transposed im2col contraction, one MXU dot per image:
        #   (C, 9C) @ (9C, HW) -> (C, HW); HW = 256 dense MXU output lanes.
        outs = []
        for n in range(N):
            p_n = jnp.concatenate(
                [pln[n * C:(n + 1) * C, :] for pln in planes], axis=0)  # (9C, HW)
            outs.append(jnp.dot(w9, p_n, preferred_element_type=jnp.float32))
        acc = jnp.concatenate(outs, axis=0)                      # (N*C, HW)

        # BatchNorm2d (training mode): one-pass per-channel stats over N*H*W in
        # f32, folded with the affine into a single scale/shift FMA.  The conv
        # bias is a per-channel constant exactly cancelled by the mean
        # subtraction -> omitted.
        r1 = jnp.sum(acc, axis=1, keepdims=True)                 # (N*C, 1)
        r2 = jnp.sum(acc * acc, axis=1, keepdims=True)           # (N*C, 1)
        s1 = r1[0:C, :]
        s2 = r2[0:C, :]
        for n in range(1, N):                                    # fold over images
            s1 = s1 + r1[n * C:(n + 1) * C, :]
            s2 = s2 + r2[n * C:(n + 1) * C, :]
        mean = s1 * inv_cnt                                      # (C, 1)
        var = s2 * inv_cnt - mean * mean                         # biased, as in BN
        scale = gamma * lax.rsqrt(var + eps)                     # (C, 1)
        shift = beta - mean * scale                              # (C, 1)
        scale_rows = jnp.concatenate([scale] * N, axis=0)        # (N*C, 1)
        shift_rows = jnp.concatenate([shift] * N, axis=0)
        return jnp.maximum(acc * scale_rows + shift_rows, 0.0)   # ReLU

    x1 = conv_bn_relu(x)              # i == 0: first application
    for _ in range(t):                # the t recurrent applications
        x1 = conv_bn_relu(x + x1)     # residual add: lane-dense VPU, in VMEM
    out_ref[...] = x1                 # (N*C, HW): full-lane, unmasked store


# ----------------------------------------------------------------------------
# Recurrent_block forward (wrapper) — only free reshapes around the kernel.
# ----------------------------------------------------------------------------
@functools.partial(jax.jit, static_argnames=("t",))
def recurrent_block_forward(x_nchw, w, b, gamma, beta, t=2):
    """x_nchw: (N, C_in, H, W); w: (C_out, C_in, 3, 3) PyTorch OIHW layout.

    `b` (conv bias) is accepted for API parity but is mathematically a no-op
    under training-mode BatchNorm (mean subtraction cancels it), so it is not
    passed to the kernel.
    """
    del b
    N, Cin, H, W = x_nchw.shape
    Cout = w.shape[0]
    assert Cin == Cout, "Recurrent_block residual add requires ch_in == ch_out"
    HW = H * W

    # OIHW -> (Cout, 9, Cin) -> (Cout, 9*Cin), columns tap-major (k*Cin + ci).
    w9 = jnp.transpose(w.reshape(Cout, Cin, 9), (0, 2, 1))
    w9 = w9.reshape(Cout, 9 * Cin).astype(jnp.float32)

    # 0/1 boundary mask per 3x3 tap: valid iff the tap's read stays inside the
    # image — this IS Conv2d(padding=1)'s zero padding.
    hh = jnp.arange(HW, dtype=jnp.int32) // W
    ww = jnp.arange(HW, dtype=jnp.int32) % W
    masks = jnp.stack(
        [((hh + dy >= 0) & (hh + dy < H) & (ww + dx >= 0) & (ww + dx < W))
         for dy in (-1, 0, 1) for dx in (-1, 0, 1)],
        axis=0).astype(jnp.float32)                               # (9, HW)

    # NCHW -> (N*C, H*W): a free reshape (no transpose around the pallas_call).
    x2d = x_nchw.reshape(N * Cin, HW).astype(jnp.float32)

    vmem = pl.BlockSpec(memory_space=pltpu.MemorySpace.VMEM)
    kernel = functools.partial(_recurrent_block_kernel, width=W, t=t, eps=1e-5)
    y2d = pl.pallas_call(
        kernel,
        out_shape=jax.ShapeDtypeStruct((N * Cout, HW), jnp.float32),
        in_specs=[vmem, vmem, vmem, vmem, vmem],
        out_specs=vmem,
        compiler_params=pltpu.CompilerParams(
            vmem_limit_bytes=32 * 1024 * 1024),
    )(x2d, w9, masks,
      gamma.reshape(Cout, 1).astype(jnp.float32),
      beta.reshape(Cout, 1).astype(jnp.float32))

    return y2d.reshape(N, Cout, H, W)                             # free reshape


# ----------------------------------------------------------------------------
# Pure-JAX reference (same math via lax.conv, conv bias included) — also checks
# the "bias cancels under training-mode BN" fold and the one-pass variance.
# ----------------------------------------------------------------------------
def _ref_stage(x_nhwc, w_hwio, b, gamma, beta):
    y = lax.conv_general_dilated(
        x_nhwc, w_hwio, window_strides=(1, 1), padding="SAME",
        dimension_numbers=("NHWC", "HWIO", "NHWC"),
        precision=lax.Precision.HIGHEST)
    y = y + b.reshape(1, 1, 1, -1)
    mean = jnp.mean(y, axis=(0, 1, 2), keepdims=True)
    var = jnp.mean((y - mean) ** 2, axis=(0, 1, 2), keepdims=True)
    y = (y - mean) * lax.rsqrt(var + 1e-5)
    y = y * gamma.reshape(1, 1, 1, -1) + beta.reshape(1, 1, 1, -1)
    return jnp.maximum(y, 0.0)


def recurrent_block_reference(x_nchw, w, b, gamma, beta, t=2):
    w_hwio = jnp.transpose(w, (2, 3, 1, 0))
    x = jnp.transpose(x_nchw, (0, 2, 3, 1)).astype(jnp.float32)
    x1 = _ref_stage(x, w_hwio, b, gamma, beta)
    for _ in range(t):
        x1 = _ref_stage(x + x1, w_hwio, b, gamma, beta)
    return jnp.transpose(x1, (0, 3, 1, 2))


if __name__ == "__main__":
    # Recurrent_block requires ch_in == ch_out for the x + x1 residual add.
    N, C, H, W = 2, 4, 16, 16
    T = 2

    key = jax.random.PRNGKey(0)
    kx, kw, kb, kg, kbt = jax.random.split(key, 5)

    x = jax.random.normal(kx, (N, C, H, W), dtype=jnp.float32)
    w = 0.2 * jax.random.normal(kw, (C, C, 3, 3), dtype=jnp.float32)   # OIHW
    b = 0.1 * jax.random.normal(kb, (C,), dtype=jnp.float32)
    gamma = 1.0 + 0.05 * jax.random.normal(kg, (C,), dtype=jnp.float32)
    beta = 0.05 * jax.random.normal(kbt, (C,), dtype=jnp.float32)

    out = recurrent_block_forward(x, w, b, gamma, beta, t=T)
    out = jax.block_until_ready(out)

    ref = recurrent_block_reference(x, w, b, gamma, beta, t=T)
    assert out.shape == (N, C, H, W), out.shape
    max_err = float(jnp.max(jnp.abs(out - ref)))
    assert jnp.allclose(out, ref, atol=5e-4, rtol=5e-4), max_err

    print("KERNEL_OK")
</pallas_src>

<mosaic_0001>
module attributes {stable_mosaic.version = 11 : i64} {
  func.func @_recurrent_block_kernel(%arg0: memref<8x256xf32, #tpu.memory_space<vmem>>, %arg1: memref<4x36xf32, #tpu.memory_space<vmem>>, %arg2: memref<9x256xf32, #tpu.memory_space<vmem>>, %arg3: memref<4x1xf32, #tpu.memory_space<vmem>>, %arg4: memref<4x1xf32, #tpu.memory_space<vmem>>, %arg5: memref<8x256xf32, #tpu.memory_space<vmem>>) attributes {dimension_semantics = [], scalar_prefetch = 0 : i64, scratch_operands = 0 : i64, tpu.core_type = #tpu.core_type<tc>} {
    %c0 = arith.constant 0 : index
    %c0_0 = arith.constant 0 : index
    %0 = vector.load %arg0[%c0, %c0_0] : memref<8x256xf32, #tpu.memory_space<vmem>>, vector<8x256xf32>
    %c0_1 = arith.constant 0 : index
    %c0_2 = arith.constant 0 : index
    %1 = vector.load %arg1[%c0_1, %c0_2] : memref<4x36xf32, #tpu.memory_space<vmem>>, vector<4x36xf32>
    %c0_3 = arith.constant 0 : index
    %c0_4 = arith.constant 0 : index
    %2 = vector.load %arg2[%c0_3, %c0_4] : memref<9x256xf32, #tpu.memory_space<vmem>>, vector<9x256xf32>
    %c0_5 = arith.constant 0 : index
    %c0_6 = arith.constant 0 : index
    %3 = vector.load %arg3[%c0_5, %c0_6] : memref<4x1xf32, #tpu.memory_space<vmem>>, vector<4x1xf32>
    %c0_7 = arith.constant 0 : index
    %c0_8 = arith.constant 0 : index
    %4 = vector.load %arg4[%c0_7, %c0_8] : memref<4x1xf32, #tpu.memory_space<vmem>>, vector<4x1xf32>
    %5 = vector.extract_strided_slice %0 {offsets = [0, 239], sizes = [8, 17], strides = [1, 1]} : vector<8x256xf32> to vector<8x17xf32>
    %6 = vector.extract_strided_slice %0 {offsets = [0, 0], sizes = [8, 239], strides = [1, 1]} : vector<8x256xf32> to vector<8x239xf32>
    %7 = tpu.concatenate %5, %6 in 1 : vector<8x17xf32>, vector<8x239xf32> -> vector<8x256xf32>
    %8 = vector.extract_strided_slice %2 {offsets = [0, 0], sizes = [1, 256], strides = [1, 1]} : vector<9x256xf32> to vector<1x256xf32>
    %9 = vector.broadcast %8 : vector<1x256xf32> to vector<8x256xf32>
    %10 = arith.mulf %7, %9 : vector<8x256xf32>
    %11 = vector.extract_strided_slice %0 {offsets = [0, 240], sizes = [8, 16], strides = [1, 1]} : vector<8x256xf32> to vector<8x16xf32>
    %12 = vector.extract_strided_slice %0 {offsets = [0, 0], sizes = [8, 240], strides = [1, 1]} : vector<8x256xf32> to vector<8x240xf32>
    %13 = tpu.concatenate %11, %12 in 1 : vector<8x16xf32>, vector<8x240xf32> -> vector<8x256xf32>
    %14 = vector.extract_strided_slice %2 {offsets = [1, 0], sizes = [1, 256], strides = [1, 1]} : vector<9x256xf32> to vector<1x256xf32>
    %15 = vector.broadcast %14 : vector<1x256xf32> to vector<8x256xf32>
    %16 = arith.mulf %13, %15 : vector<8x256xf32>
    %17 = vector.extract_strided_slice %0 {offsets = [0, 241], sizes = [8, 15], strides = [1, 1]} : vector<8x256xf32> to vector<8x15xf32>
    %18 = vector.extract_strided_slice %0 {offsets = [0, 0], sizes = [8, 241], strides = [1, 1]} : vector<8x256xf32> to vector<8x241xf32>
    %19 = tpu.concatenate %17, %18 in 1 : vector<8x15xf32>, vector<8x241xf32> -> vector<8x256xf32>
    %20 = vector.extract_strided_slice %2 {offsets = [2, 0], sizes = [1, 256], strides = [1, 1]} : vector<9x256xf32> to vector<1x256xf32>
    %21 = vector.broadcast %20 : vector<1x256xf32> to vector<8x256xf32>
    %22 = arith.mulf %19, %21 : vector<8x256xf32>
    %23 = vector.extract_strided_slice %0 {offsets = [0, 255], sizes = [8, 1], strides = [1, 1]} : vector<8x256xf32> to vector<8x1xf32>
    %24 = vector.extract_strided_slice %0 {offsets = [0, 0], sizes = [8, 255], strides = [1, 1]} : vector<8x256xf32> to vector<8x255xf32>
    %25 = tpu.concatenate %23, %24 in 1 : vector<8x1xf32>, vector<8x255xf32> -> vector<8x256xf32>
    %26 = vector.extract_strided_slice %2 {offsets = [3, 0], sizes = [1, 256], strides = [1, 1]} : vector<9x256xf32> to vector<1x256xf32>
    %27 = vector.broadcast %26 : vector<1x256xf32> to vector<8x256xf32>
    %28 = arith.mulf %25, %27 : vector<8x256xf32>
    %29 = vector.extract_strided_slice %2 {offsets = [4, 0], sizes = [1, 256], strides = [1, 1]} : vector<9x256xf32> to vector<1x256xf32>
    %30 = vector.broadcast %29 : vector<1x256xf32> to vector<8x256xf32>
    %31 = arith.mulf %0, %30 : vector<8x256xf32>
    %32 = vector.extract_strided_slice %0 {offsets = [0, 1], sizes = [8, 255], strides = [1, 1]} : vector<8x256xf32> to vector<8x255xf32>
    %33 = vector.extract_strided_slice %0 {offsets = [0, 0], sizes = [8, 1], strides = [1, 1]} : vector<8x256xf32> to vector<8x1xf32>
    %34 = tpu.concatenate %32, %33 in 1 : vector<8x255xf32>, vector<8x1xf32> -> vector<8x256xf32>
    %35 = vector.extract_strided_slice %2 {offsets = [5, 0], sizes = [1, 256], strides = [1, 1]} : vector<9x256xf32> to vector<1x256xf32>
    %36 = vector.broadcast %35 : vector<1x256xf32> to vector<8x256xf32>
    %37 = arith.mulf %34, %36 : vector<8x256xf32>
    %38 = vector.extract_strided_slice %0 {offsets = [0, 15], sizes = [8, 241], strides = [1, 1]} : vector<8x256xf32> to vector<8x241xf32>
    %39 = vector.extract_strided_slice %0 {offsets = [0, 0], sizes = [8, 15], strides = [1, 1]} : vector<8x256xf32> to vector<8x15xf32>
    %40 = tpu.concatenate %38, %39 in 1 : vector<8x241xf32>, vector<8x15xf32> -> vector<8x256xf32>
    %41 = vector.extract_strided_slice %2 {offsets = [6, 0], sizes = [1, 256], strides = [1, 1]} : vector<9x256xf32> to vector<1x256xf32>
    %42 = vector.broadcast %41 : vector<1x256xf32> to vector<8x256xf32>
    %43 = arith.mulf %40, %42 : vector<8x256xf32>
    %44 = vector.extract_strided_slice %0 {offsets = [0, 16], sizes = [8, 240], strides = [1, 1]} : vector<8x256xf32> to vector<8x240xf32>
    %45 = vector.extract_strided_slice %0 {offsets = [0, 0], sizes = [8, 16], strides = [1, 1]} : vector<8x256xf32> to vector<8x16xf32>
    %46 = tpu.concatenate %44, %45 in 1 : vector<8x240xf32>, vector<8x16xf32> -> vector<8x256xf32>
    %47 = vector.extract_strided_slice %2 {offsets = [7, 0], sizes = [1, 256], strides = [1, 1]} : vector<9x256xf32> to vector<1x256xf32>
    %48 = vector.broadcast %47 : vector<1x256xf32> to vector<8x256xf32>
    %49 = arith.mulf %46, %48 : vector<8x256xf32>
    %50 = vector.extract_strided_slice %0 {offsets = [0, 17], sizes = [8, 239], strides = [1, 1]} : vector<8x256xf32> to vector<8x239xf32>
    %51 = vector.extract_strided_slice %0 {offsets = [0, 0], sizes = [8, 17], strides = [1, 1]} : vector<8x256xf32> to vector<8x17xf32>
    %52 = tpu.concatenate %50, %51 in 1 : vector<8x239xf32>, vector<8x17xf32> -> vector<8x256xf32>
    %53 = vector.extract_strided_slice %2 {offsets = [8, 0], sizes = [1, 256], strides = [1, 1]} : vector<9x256xf32> to vector<1x256xf32>
    %54 = vector.broadcast %53 : vector<1x256xf32> to vector<8x256xf32>
    %55 = arith.mulf %52, %54 : vector<8x256xf32>
    %56 = vector.extract_strided_slice %10 {offsets = [0, 0], sizes = [4, 256], strides = [1, 1]} : vector<8x256xf32> to vector<4x256xf32>
    %57 = vector.extract_strided_slice %16 {offsets = [0, 0], sizes = [4, 256], strides = [1, 1]} : vector<8x256xf32> to vector<4x256xf32>
    %58 = vector.extract_strided_slice %22 {offsets = [0, 0], sizes = [4, 256], strides = [1, 1]} : vector<8x256xf32> to vector<4x256xf32>
    %59 = vector.extract_strided_slice %28 {offsets = [0, 0], sizes = [4, 256], strides = [1, 1]} : vector<8x256xf32> to vector<4x256xf32>
    %60 = vector.extract_strided_slice %31 {offsets = [0, 0], sizes = [4, 256], strides = [1, 1]} : vector<8x256xf32> to vector<4x256xf32>
    %61 = vector.extract_strided_slice %37 {offsets = [0, 0], sizes = [4, 256], strides = [1, 1]} : vector<8x256xf32> to vector<4x256xf32>
    %62 = vector.extract_strided_slice %43 {offsets = [0, 0], sizes = [4, 256], strides = [1, 1]} : vector<8x256xf32> to vector<4x256xf32>
    %63 = vector.extract_strided_slice %49 {offsets = [0, 0], sizes = [4, 256], strides = [1, 1]} : vector<8x256xf32> to vector<4x256xf32>
    %64 = vector.extract_strided_slice %55 {offsets = [0, 0], sizes = [4, 256], strides = [1, 1]} : vector<8x256xf32> to vector<4x256xf32>
    %65 = tpu.concatenate %56, %57, %58, %59, %60, %61, %62, %63, %64 in 0 : vector<4x256xf32>, vector<4x256xf32>, vector<4x256xf32>, vector<4x256xf32>, vector<4x256xf32>, vector<4x256xf32>, vector<4x256xf32>, vector<4x256xf32>, vector<4x256xf32> -> vector<36x256xf32>
    %cst = arith.constant dense<0.000000e+00> : vector<4x256xf32>
    %66 = tpu.matmul %1, %65, %cst {dimension_numbers = #tpu.dot_dimension_numbers<[1], [0], [0], [1], [0, 0, 1, 1], [], []>} : vector<4x36xf32>, vector<36x256xf32>, vector<4x256xf32> -> vector<4x256xf32>
    %67 = vector.extract_strided_slice %10 {offsets = [4, 0], sizes = [4, 256], strides = [1, 1]} : vector<8x256xf32> to vector<4x256xf32>
    %68 = vector.extract_strided_slice %16 {offsets = [4, 0], sizes = [4, 256], strides = [1, 1]} : vector<8x256xf32> to vector<4x256xf32>
    %69 = vector.extract_strided_slice %22 {offsets = [4, 0], sizes = [4, 256], strides = [1, 1]} : vector<8x256xf32> to vector<4x256xf32>
    %70 = vector.extract_strided_slice %28 {offsets = [4, 0], sizes = [4, 256], strides = [1, 1]} : vector<8x256xf32> to vector<4x256xf32>
    %71 = vector.extract_strided_slice %31 {offsets = [4, 0], sizes = [4, 256], strides = [1, 1]} : vector<8x256xf32> to vector<4x256xf32>
    %72 = vector.extract_strided_slice %37 {offsets = [4, 0], sizes = [4, 256], strides = [1, 1]} : vector<8x256xf32> to vector<4x256xf32>
    %73 = vector.extract_strided_slice %43 {offsets = [4, 0], sizes = [4, 256], strides = [1, 1]} : vector<8x256xf32> to vector<4x256xf32>
    %74 = vector.extract_strided_slice %49 {offsets = [4, 0], sizes = [4, 256], strides = [1, 1]} : vector<8x256xf32> to vector<4x256xf32>
    %75 = vector.extract_strided_slice %55 {offsets = [4, 0], sizes = [4, 256], strides = [1, 1]} : vector<8x256xf32> to vector<4x256xf32>
    %76 = tpu.concatenate %67, %68, %69, %70, %71, %72, %73, %74, %75 in 0 : vector<4x256xf32>, vector<4x256xf32>, vector<4x256xf32>, vector<4x256xf32>, vector<4x256xf32>, vector<4x256xf32>, vector<4x256xf32>, vector<4x256xf32>, vector<4x256xf32> -> vector<36x256xf32>
    %cst_9 = arith.constant dense<0.000000e+00> : vector<4x256xf32>
    %77 = tpu.matmul %1, %76, %cst_9 {dimension_numbers = #tpu.dot_dimension_numbers<[1], [0], [0], [1], [0, 0, 1, 1], [], []>} : vector<4x36xf32>, vector<36x256xf32>, vector<4x256xf32> -> vector<4x256xf32>
    %78 = tpu.concatenate %66, %77 in 0 : vector<4x256xf32>, vector<4x256xf32> -> vector<8x256xf32>
    %cst_10 = arith.constant dense<0.000000e+00> : vector<8xf32>
    %79 = vector.multi_reduction <add>, %78, %cst_10 [1] : vector<8x256xf32> to vector<8xf32>
    %80 = vector.shape_cast %79 : vector<8xf32> to vector<8x1xf32>
    %81 = arith.mulf %78, %78 : vector<8x256xf32>
    %cst_11 = arith.constant dense<0.000000e+00> : vector<8xf32>
    %82 = vector.multi_reduction <add>, %81, %cst_11 [1] : vector<8x256xf32> to vector<8xf32>
    %83 = vector.shape_cast %82 : vector<8xf32> to vector<8x1xf32>
    %84 = vector.extract_strided_slice %80 {offsets = [0, 0], sizes = [4, 1], strides = [1, 1]} : vector<8x1xf32> to vector<4x1xf32>
    %85 = vector.extract_strided_slice %83 {offsets = [0, 0], sizes = [4, 1], strides = [1, 1]} : vector<8x1xf32> to vector<4x1xf32>
    %86 = vector.extract_strided_slice %80 {offsets = [4, 0], sizes = [4, 1], strides = [1, 1]} : vector<8x1xf32> to vector<4x1xf32>
    %87 = arith.addf %84, %86 : vector<4x1xf32>
    %88 = vector.extract_strided_slice %83 {offsets = [4, 0], sizes = [4, 1], strides = [1, 1]} : vector<8x1xf32> to vector<4x1xf32>
    %89 = arith.addf %85, %88 : vector<4x1xf32>
    %cst_12 = arith.constant 0.001953125 : f32
    %90 = vector.broadcast %cst_12 : f32 to vector<4x1xf32>
    %91 = arith.mulf %87, %90 : vector<4x1xf32>
    %cst_13 = arith.constant 0.001953125 : f32
    %92 = vector.broadcast %cst_13 : f32 to vector<4x1xf32>
    %93 = arith.mulf %89, %92 : vector<4x1xf32>
    %94 = arith.mulf %91, %91 : vector<4x1xf32>
    %95 = arith.subf %93, %94 : vector<4x1xf32>
    %cst_14 = arith.constant 9.99999974E-6 : f32
    %96 = vector.broadcast %cst_14 : f32 to vector<4x1xf32>
    %97 = arith.addf %95, %96 : vector<4x1xf32>
    %98 = math.rsqrt %97 : vector<4x1xf32>
    %99 = arith.mulf %3, %98 : vector<4x1xf32>
    %100 = arith.mulf %91, %99 : vector<4x1xf32>
    %101 = arith.subf %4, %100 : vector<4x1xf32>
    %102 = tpu.concatenate %99, %99 in 0 : vector<4x1xf32>, vector<4x1xf32> -> vector<8x1xf32>
    %103 = tpu.concatenate %101, %101 in 0 : vector<4x1xf32>, vector<4x1xf32> -> vector<8x1xf32>
    %104 = vector.broadcast %102 : vector<8x1xf32> to vector<8x256xf32>
    %105 = arith.mulf %78, %104 : vector<8x256xf32>
    %106 = vector.broadcast %103 : vector<8x1xf32> to vector<8x256xf32>
    %107 = arith.addf %105, %106 : vector<8x256xf32>
    %cst_15 = arith.constant 0.000000e+00 : f32
    %108 = vector.broadcast %cst_15 : f32 to vector<8x256xf32>
    %109 = arith.maximumf %107, %108 : vector<8x256xf32>
    %110 = arith.addf %0, %109 : vector<8x256xf32>
    %111 = vector.extract_strided_slice %110 {offsets = [0, 239], sizes = [8, 17], strides = [1, 1]} : vector<8x256xf32> to vector<8x17xf32>
    %112 = vector.extract_strided_slice %110 {offsets = [0, 0], sizes = [8, 239], strides = [1, 1]} : vector<8x256xf32> to vector<8x239xf32>
    %113 = tpu.concatenate %111, %112 in 1 : vector<8x17xf32>, vector<8x239xf32> -> vector<8x256xf32>
    %114 = vector.extract_strided_slice %2 {offsets = [0, 0], sizes = [1, 256], strides = [1, 1]} : vector<9x256xf32> to vector<1x256xf32>
    %115 = vector.broadcast %114 : vector<1x256xf32> to vector<8x256xf32>
    %116 = arith.mulf %113, %115 : vector<8x256xf32>
    %117 = vector.extract_strided_slice %110 {offsets = [0, 240], sizes = [8, 16], strides = [1, 1]} : vector<8x256xf32> to vector<8x16xf32>
    %118 = vector.extract_strided_slice %110 {offsets = [0, 0], sizes = [8, 240], strides = [1, 1]} : vector<8x256xf32> to vector<8x240xf32>
    %119 = tpu.concatenate %117, %118 in 1 : vector<8x16xf32>, vector<8x240xf32> -> vector<8x256xf32>
    %120 = vector.extract_strided_slice %2 {offsets = [1, 0], sizes = [1, 256], strides = [1, 1]} : vector<9x256xf32> to vector<1x256xf32>
    %121 = vector.broadcast %120 : vector<1x256xf32> to vector<8x256xf32>
    %122 = arith.mulf %119, %121 : vector<8x256xf32>
    %123 = vector.extract_strided_slice %110 {offsets = [0, 241], sizes = [8, 15], strides = [1, 1]} : vector<8x256xf32> to vector<8x15xf32>
    %124 = vector.extract_strided_slice %110 {offsets = [0, 0], sizes = [8, 241], strides = [1, 1]} : vector<8x256xf32> to vector<8x241xf32>
    %125 = tpu.concatenate %123, %124 in 1 : vector<8x15xf32>, vector<8x241xf32> -> vector<8x256xf32>
    %126 = vector.extract_strided_slice %2 {offsets = [2, 0], sizes = [1, 256], strides = [1, 1]} : vector<9x256xf32> to vector<1x256xf32>
    %127 = vector.broadcast %126 : vector<1x256xf32> to vector<8x256xf32>
    %128 = arith.mulf %125, %127 : vector<8x256xf32>
    %129 = vector.extract_strided_slice %110 {offsets = [0, 255], sizes = [8, 1], strides = [1, 1]} : vector<8x256xf32> to vector<8x1xf32>
    %130 = vector.extract_strided_slice %110 {offsets = [0, 0], sizes = [8, 255], strides = [1, 1]} : vector<8x256xf32> to vector<8x255xf32>
    %131 = tpu.concatenate %129, %130 in 1 : vector<8x1xf32>, vector<8x255xf32> -> vector<8x256xf32>
    %132 = vector.extract_strided_slice %2 {offsets = [3, 0], sizes = [1, 256], strides = [1, 1]} : vector<9x256xf32> to vector<1x256xf32>
    %133 = vector.broadcast %132 : vector<1x256xf32> to vector<8x256xf32>
    %134 = arith.mulf %131, %133 : vector<8x256xf32>
    %135 = vector.extract_strided_slice %2 {offsets = [4, 0], sizes = [1, 256], strides = [1, 1]} : vector<9x256xf32> to vector<1x256xf32>
    %136 = vector.broadcast %135 : vector<1x256xf32> to vector<8x256xf32>
    %137 = arith.mulf %110, %136 : vector<8x256xf32>
    %138 = vector.extract_strided_slice %110 {offsets = [0, 1], sizes = [8, 255], strides = [1, 1]} : vector<8x256xf32> to vector<8x255xf32>
    %139 = vector.extract_strided_slice %110 {offsets = [0, 0], sizes = [8, 1], strides = [1, 1]} : vector<8x256xf32> to vector<8x1xf32>
    %140 = tpu.concatenate %138, %139 in 1 : vector<8x255xf32>, vector<8x1xf32> -> vector<8x256xf32>
    %141 = vector.extract_strided_slice %2 {offsets = [5, 0], sizes = [1, 256], strides = [1, 1]} : vector<9x256xf32> to vector<1x256xf32>
    %142 = vector.broadcast %141 : vector<1x256xf32> to vector<8x256xf32>
    %143 = arith.mulf %140, %142 : vector<8x256xf32>
    %144 = vector.extract_strided_slice %110 {offsets = [0, 15], sizes = [8, 241], strides = [1, 1]} : vector<8x256xf32> to vector<8x241xf32>
    %145 = vector.extract_strided_slice %110 {offsets = [0, 0], sizes = [8, 15], strides = [1, 1]} : vector<8x256xf32> to vector<8x15xf32>
    %146 = tpu.concatenate %144, %145 in 1 : vector<8x241xf32>, vector<8x15xf32> -> vector<8x256xf32>
    %147 = vector.extract_strided_slice %2 {offsets = [6, 0], sizes = [1, 256], strides = [1, 1]} : vector<9x256xf32> to vector<1x256xf32>
    %148 = vector.broadcast %147 : vector<1x256xf32> to vector<8x256xf32>
    %149 = arith.mulf %146, %148 : vector<8x256xf32>
    %150 = vector.extract_strided_slice %110 {offsets = [0, 16], sizes = [8, 240], strides = [1, 1]} : vector<8x256xf32> to vector<8x240xf32>
    %151 = vector.extract_strided_slice %110 {offsets = [0, 0], sizes = [8, 16], strides = [1, 1]} : vector<8x256xf32> to vector<8x16xf32>
    %152 = tpu.concatenate %150, %151 in 1 : vector<8x240xf32>, vector<8x16xf32> -> vector<8x256xf32>
    %153 = vector.extract_strided_slice %2 {offsets = [7, 0], sizes = [1, 256], strides = [1, 1]} : vector<9x256xf32> to vector<1x256xf32>
    %154 = vector.broadcast %153 : vector<1x256xf32> to vector<8x256xf32>
    %155 = arith.mulf %152, %154 : vector<8x256xf32>
    %156 = vector.extract_strided_slice %110 {offsets = [0, 17], sizes = [8, 239], strides = [1, 1]} : vector<8x256xf32> to vector<8x239xf32>
    %157 = vector.extract_strided_slice %110 {offsets = [0, 0], sizes = [8, 17], strides = [1, 1]} : vector<8x256xf32> to vector<8x17xf32>
    %158 = tpu.concatenate %156, %157 in 1 : vector<8x239xf32>, vector<8x17xf32> -> vector<8x256xf32>
    %159 = vector.extract_strided_slice %2 {offsets = [8, 0], sizes = [1, 256], strides = [1, 1]} : vector<9x256xf32> to vector<1x256xf32>
    %160 = vector.broadcast %159 : vector<1x256xf32> to vector<8x256xf32>
    %161 = arith.mulf %158, %160 : vector<8x256xf32>
    %162 = vector.extract_strided_slice %116 {offsets = [0, 0], sizes = [4, 256], strides = [1, 1]} : vector<8x256xf32> to vector<4x256xf32>
    %163 = vector.extract_strided_slice %122 {offsets = [0, 0], sizes = [4, 256], strides = [1, 1]} : vector<8x256xf32> to vector<4x256xf32>
    %164 = vector.extract_strided_slice %128 {offsets = [0, 0], sizes = [4, 256], strides = [1, 1]} : vector<8x256xf32> to vector<4x256xf32>
    %165 = vector.extract_strided_slice %134 {offsets = [0, 0], sizes = [4, 256], strides = [1, 1]} : vector<8x256xf32> to vector<4x256xf32>
    %166 = vector.extract_strided_slice %137 {offsets = [0, 0], sizes = [4, 256], strides = [1, 1]} : vector<8x256xf32> to vector<4x256xf32>
    %167 = vector.extract_strided_slice %143 {offsets = [0, 0], sizes = [4, 256], strides = [1, 1]} : vector<8x256xf32> to vector<4x256xf32>
    %168 = vector.extract_strided_slice %149 {offsets = [0, 0], sizes = [4, 256], strides = [1, 1]} : vector<8x256xf32> to vector<4x256xf32>
    %169 = vector.extract_strided_slice %155 {offsets = [0, 0], sizes = [4, 256], strides = [1, 1]} : vector<8x256xf32> to vector<4x256xf32>
    %170 = vector.extract_strided_slice %161 {offsets = [0, 0], sizes = [4, 256], strides = [1, 1]} : vector<8x256xf32> to vector<4x256xf32>
    %171 = tpu.concatenate %162, %163, %164, %165, %166, %167, %168, %169, %170 in 0 : vector<4x256xf32>, vector<4x256xf32>, vector<4x256xf32>, vector<4x256xf32>, vector<4x256xf32>, vector<4x256xf32>, vector<4x256xf32>, vector<4x256xf32>, vector<4x256xf32> -> vector<36x256xf32>
    %cst_16 = arith.constant dense<0.000000e+00> : vector<4x256xf32>
    %172 = tpu.matmul %1, %171, %cst_16 {dimension_numbers = #tpu.dot_dimension_numbers<[1], [0], [0], [1], [0, 0, 1, 1], [], []>} : vector<4x36xf32>, vector<36x256xf32>, vector<4x256xf32> -> vector<4x256xf32>
    %173 = vector.extract_strided_slice %116 {offsets = [4, 0], sizes = [4, 256], strides = [1, 1]} : vector<8x256xf32> to vector<4x256xf32>
    %174 = vector.extract_strided_slice %122 {offsets = [4, 0], sizes = [4, 256], strides = [1, 1]} : vector<8x256xf32> to vector<4x256xf32>
    %175 = vector.extract_strided_slice %128 {offsets = [4, 0], sizes = [4, 256], strides = [1, 1]} : vector<8x256xf32> to vector<4x256xf32>
    %176 = vector.extract_strided_slice %134 {offsets = [4, 0], sizes = [4, 256], strides = [1, 1]} : vector<8x256xf32> to vector<4x256xf32>
    %177 = vector.extract_strided_slice %137 {offsets = [4, 0], sizes = [4, 256], strides = [1, 1]} : vector<8x256xf32> to vector<4x256xf32>
    %178 = vector.extract_strided_slice %143 {offsets = [4, 0], sizes = [4, 256], strides = [1, 1]} : vector<8x256xf32> to vector<4x256xf32>
    %179 = vector.extract_strided_slice %149 {offsets = [4, 0], sizes = [4, 256], strides = [1, 1]} : vector<8x256xf32> to vector<4x256xf32>
    %180 = vector.extract_strided_slice %155 {offsets = [4, 0], sizes = [4, 256], strides = [1, 1]} : vector<8x256xf32> to vector<4x256xf32>
    %181 = vector.extract_strided_slice %161 {offsets = [4, 0], sizes = [4, 256], strides = [1, 1]} : vector<8x256xf32> to vector<4x256xf32>
    %182 = tpu.concatenate %173, %174, %175, %176, %177, %178, %179, %180, %181 in 0 : vector<4x256xf32>, vector<4x256xf32>, vector<4x256xf32>, vector<4x256xf32>, vector<4x256xf32>, vector<4x256xf32>, vector<4x256xf32>, vector<4x256xf32>, vector<4x256xf32> -> vector<36x256xf32>
    %cst_17 = arith.constant dense<0.000000e+00> : vector<4x256xf32>
    %183 = tpu.matmul %1, %182, %cst_17 {dimension_numbers = #tpu.dot_dimension_numbers<[1], [0], [0], [1], [0, 0, 1, 1], [], []>} : vector<4x36xf32>, vector<36x256xf32>, vector<4x256xf32> -> vector<4x256xf32>
    %184 = tpu.concatenate %172, %183 in 0 : vector<4x256xf32>, vector<4x256xf32> -> vector<8x256xf32>
    %cst_18 = arith.constant dense<0.000000e+00> : vector<8xf32>
    %185 = vector.multi_reduction <add>, %184, %cst_18 [1] : vector<8x256xf32> to vector<8xf32>
    %186 = vector.shape_cast %185 : vector<8xf32> to vector<8x1xf32>
    %187 = arith.mulf %184, %184 : vector<8x256xf32>
    %cst_19 = arith.constant dense<0.000000e+00> : vector<8xf32>
    %188 = vector.multi_reduction <add>, %187, %cst_19 [1] : vector<8x256xf32> to vector<8xf32>
    %189 = vector.shape_cast %188 : vector<8xf32> to vector<8x1xf32>
    %190 = vector.extract_strided_slice %186 {offsets = [0, 0], sizes = [4, 1], strides = [1, 1]} : vector<8x1xf32> to vector<4x1xf32>
    %191 = vector.extract_strided_slice %189 {offsets = [0, 0], sizes = [4, 1], strides = [1, 1]} : vector<8x1xf32> to vector<4x1xf32>
    %192 = vector.extract_strided_slice %186 {offsets = [4, 0], sizes = [4, 1], strides = [1, 1]} : vector<8x1xf32> to vector<4x1xf32>
    %193 = arith.addf %190, %192 : vector<4x1xf32>
    %194 = vector.extract_strided_slice %189 {offsets = [4, 0], sizes = [4, 1], strides = [1, 1]} : vector<8x1xf32> to vector<4x1xf32>
    %195 = arith.addf %191, %194 : vector<4x1xf32>
    %cst_20 = arith.constant 0.001953125 : f32
    %196 = vector.broadcast %cst_20 : f32 to vector<4x1xf32>
    %197 = arith.mulf %193, %196 : vector<4x1xf32>
    %cst_21 = arith.constant 0.001953125 : f32
    %198 = vector.broadcast %cst_21 : f32 to vector<4x1xf32>
    %199 = arith.mulf %195, %198 : vector<4x1xf32>
    %200 = arith.mulf %197, %197 : vector<4x1xf32>
    %201 = arith.subf %199, %200 : vector<4x1xf32>
    %cst_22 = arith.constant 9.99999974E-6 : f32
    %202 = vector.broadcast %cst_22 : f32 to vector<4x1xf32>
    %203 = arith.addf %201, %202 : vector<4x1xf32>
    %204 = math.rsqrt %203 : vector<4x1xf32>
    %205 = arith.mulf %3, %204 : vector<4x1xf32>
    %206 = arith.mulf %197, %205 : vector<4x1xf32>
    %207 = arith.subf %4, %206 : vector<4x1xf32>
    %208 = tpu.concatenate %205, %205 in 0 : vector<4x1xf32>, vector<4x1xf32> -> vector<8x1xf32>
    %209 = tpu.concatenate %207, %207 in 0 : vector<4x1xf32>, vector<4x1xf32> -> vector<8x1xf32>
    %210 = vector.broadcast %208 : vector<8x1xf32> to vector<8x256xf32>
    %211 = arith.mulf %184, %210 : vector<8x256xf32>
    %212 = vector.broadcast %209 : vector<8x1xf32> to vector<8x256xf32>
    %213 = arith.addf %211, %212 : vector<8x256xf32>
    %cst_23 = arith.constant 0.000000e+00 : f32
    %214 = vector.broadcast %cst_23 : f32 to vector<8x256xf32>
    %215 = arith.maximumf %213, %214 : vector<8x256xf32>
    %216 = arith.addf %0, %215 : vector<8x256xf32>
    %217 = vector.extract_strided_slice %216 {offsets = [0, 239], sizes = [8, 17], strides = [1, 1]} : vector<8x256xf32> to vector<8x17xf32>
    %218 = vector.extract_strided_slice %216 {offsets = [0, 0], sizes = [8, 239], strides = [1, 1]} : vector<8x256xf32> to vector<8x239xf32>
    %219 = tpu.concatenate %217, %218 in 1 : vector<8x17xf32>, vector<8x239xf32> -> vector<8x256xf32>
    %220 = vector.extract_strided_slice %2 {offsets = [0, 0], sizes = [1, 256], strides = [1, 1]} : vector<9x256xf32> to vector<1x256xf32>
    %221 = vector.broadcast %220 : vector<1x256xf32> to vector<8x256xf32>
    %222 = arith.mulf %219, %221 : vector<8x256xf32>
    %223 = vector.extract_strided_slice %216 {offsets = [0, 240], sizes = [8, 16], strides = [1, 1]} : vector<8x256xf32> to vector<8x16xf32>
    %224 = vector.extract_strided_slice %216 {offsets = [0, 0], sizes = [8, 240], strides = [1, 1]} : vector<8x256xf32> to vector<8x240xf32>
    %225 = tpu.concatenate %223, %224 in 1 : vector<8x16xf32>, vector<8x240xf32> -> vector<8x256xf32>
    %226 = vector.extract_strided_slice %2 {offsets = [1, 0], sizes = [1, 256], strides = [1, 1]} : vector<9x256xf32> to vector<1x256xf32>
    %227 = vector.broadcast %226 : vector<1x256xf32> to vector<8x256xf32>
    %228 = arith.mulf %225, %227 : vector<8x256xf32>
    %229 = vector.extract_strided_slice %216 {offsets = [0, 241], sizes = [8, 15], strides = [1, 1]} : vector<8x256xf32> to vector<8x15xf32>
    %230 = vector.extract_strided_slice %216 {offsets = [0, 0], sizes = [8, 241], strides = [1, 1]} : vector<8x256xf32> to vector<8x241xf32>
    %231 = tpu.concatenate %229, %230 in 1 : vector<8x15xf32>, vector<8x241xf32> -> vector<8x256xf32>
    %232 = vector.extract_strided_slice %2 {offsets = [2, 0], sizes = [1, 256], strides = [1, 1]} : vector<9x256xf32> to vector<1x256xf32>
    %233 = vector.broadcast %232 : vector<1x256xf32> to vector<8x256xf32>
    %234 = arith.mulf %231, %233 : vector<8x256xf32>
    %235 = vector.extract_strided_slice %216 {offsets = [0, 255], sizes = [8, 1], strides = [1, 1]} : vector<8x256xf32> to vector<8x1xf32>
    %236 = vector.extract_strided_slice %216 {offsets = [0, 0], sizes = [8, 255], strides = [1, 1]} : vector<8x256xf32> to vector<8x255xf32>
    %237 = tpu.concatenate %235, %236 in 1 : vector<8x1xf32>, vector<8x255xf32> -> vector<8x256xf32>
    %238 = vector.extract_strided_slice %2 {offsets = [3, 0], sizes = [1, 256], strides = [1, 1]} : vector<9x256xf32> to vector<1x256xf32>
    %239 = vector.broadcast %238 : vector<1x256xf32> to vector<8x256xf32>
    %240 = arith.mulf %237, %239 : vector<8x256xf32>
    %241 = vector.extract_strided_slice %2 {offsets = [4, 0], sizes = [1, 256], strides = [1, 1]} : vector<9x256xf32> to vector<1x256xf32>
    %242 = vector.broadcast %241 : vector<1x256xf32> to vector<8x256xf32>
    %243 = arith.mulf %216, %242 : vector<8x256xf32>
    %244 = vector.extract_strided_slice %216 {offsets = [0, 1], sizes = [8, 255], strides = [1, 1]} : vector<8x256xf32> to vector<8x255xf32>
    %245 = vector.extract_strided_slice %216 {offsets = [0, 0], sizes = [8, 1], strides = [1, 1]} : vector<8x256xf32> to vector<8x1xf32>
    %246 = tpu.concatenate %244, %245 in 1 : vector<8x255xf32>, vector<8x1xf32> -> vector<8x256xf32>
    %247 = vector.extract_strided_slice %2 {offsets = [5, 0], sizes = [1, 256], strides = [1, 1]} : vector<9x256xf32> to vector<1x256xf32>
    %248 = vector.broadcast %247 : vector<1x256xf32> to vector<8x256xf32>
    %249 = arith.mulf %246, %248 : vector<8x256xf32>
    %250 = vector.extract_strided_slice %216 {offsets = [0, 15], sizes = [8, 241], strides = [1, 1]} : vector<8x256xf32> to vector<8x241xf32>
    %251 = vector.extract_strided_slice %216 {offsets = [0, 0], sizes = [8, 15], strides = [1, 1]} : vector<8x256xf32> to vector<8x15xf32>
    %252 = tpu.concatenate %250, %251 in 1 : vector<8x241xf32>, vector<8x15xf32> -> vector<8x256xf32>
    %253 = vector.extract_strided_slice %2 {offsets = [6, 0], sizes = [1, 256], strides = [1, 1]} : vector<9x256xf32> to vector<1x256xf32>
    %254 = vector.broadcast %253 : vector<1x256xf32> to vector<8x256xf32>
    %255 = arith.mulf %252, %254 : vector<8x256xf32>
    %256 = vector.extract_strided_slice %216 {offsets = [0, 16], sizes = [8, 240], strides = [1, 1]} : vector<8x256xf32> to vector<8x240xf32>
    %257 = vector.extract_strided_slice %216 {offsets = [0, 0], sizes = [8, 16], strides = [1, 1]} : vector<8x256xf32> to vector<8x16xf32>
    %258 = tpu.concatenate %256, %257 in 1 : vector<8x240xf32>, vector<8x16xf32> -> vector<8x256xf32>
    %259 = vector.extract_strided_slice %2 {offsets = [7, 0], sizes = [1, 256], strides = [1, 1]} : vector<9x256xf32> to vector<1x256xf32>
    %260 = vector.broadcast %259 : vector<1x256xf32> to vector<8x256xf32>
    %261 = arith.mulf %258, %260 : vector<8x256xf32>
    %262 = vector.extract_strided_slice %216 {offsets = [0, 17], sizes = [8, 239], strides = [1, 1]} : vector<8x256xf32> to vector<8x239xf32>
    %263 = vector.extract_strided_slice %216 {offsets = [0, 0], sizes = [8, 17], strides = [1, 1]} : vector<8x256xf32> to vector<8x17xf32>
    %264 = tpu.concatenate %262, %263 in 1 : vector<8x239xf32>, vector<8x17xf32> -> vector<8x256xf32>
    %265 = vector.extract_strided_slice %2 {offsets = [8, 0], sizes = [1, 256], strides = [1, 1]} : vector<9x256xf32> to vector<1x256xf32>
    %266 = vector.broadcast %265 : vector<1x256xf32> to vector<8x256xf32>
    %267 = arith.mulf %264, %266 : vector<8x256xf32>
    %268 = vector.extract_strided_slice %222 {offsets = [0, 0], sizes = [4, 256], strides = [1, 1]} : vector<8x256xf32> to vector<4x256xf32>
    %269 = vector.extract_strided_slice %228 {offsets = [0, 0], sizes = [4, 256], strides = [1, 1]} : vector<8x256xf32> to vector<4x256xf32>
    %270 = vector.extract_strided_slice %234 {offsets = [0, 0], sizes = [4, 256], strides = [1, 1]} : vector<8x256xf32> to vector<4x256xf32>
    %271 = vector.extract_strided_slice %240 {offsets = [0, 0], sizes = [4, 256], strides = [1, 1]} : vector<8x256xf32> to vector<4x256xf32>
    %272 = vector.extract_strided_slice %243 {offsets = [0, 0], sizes = [4, 256], strides = [1, 1]} : vector<8x256xf32> to vector<4x256xf32>
    %273 = vector.extract_strided_slice %249 {offsets = [0, 0], sizes = [4, 256], strides = [1, 1]} : vector<8x256xf32> to vector<4x256xf32>
    %274 = vector.extract_strided_slice %255 {offsets = [0, 0], sizes = [4, 256], strides = [1, 1]} : vector<8x256xf32> to vector<4x256xf32>
    %275 = vector.extract_strided_slice %261 {offsets = [0, 0], sizes = [4, 256], strides = [1, 1]} : vector<8x256xf32> to vector<4x256xf32>
    %276 = vector.extract_strided_slice %267 {offsets = [0, 0], sizes = [4, 256], strides = [1, 1]} : vector<8x256xf32> to vector<4x256xf32>
    %277 = tpu.concatenate %268, %269, %270, %271, %272, %273, %274, %275, %276 in 0 : vector<4x256xf32>, vector<4x256xf32>, vector<4x256xf32>, vector<4x256xf32>, vector<4x256xf32>, vector<4x256xf32>, vector<4x256xf32>, vector<4x256xf32>, vector<4x256xf32> -> vector<36x256xf32>
    %cst_24 = arith.constant dense<0.000000e+00> : vector<4x256xf32>
    %278 = tpu.matmul %1, %277, %cst_24 {dimension_numbers = #tpu.dot_dimension_numbers<[1], [0], [0], [1], [0, 0, 1, 1], [], []>} : vector<4x36xf32>, vector<36x256xf32>, vector<4x256xf32> -> vector<4x256xf32>
    %279 = vector.extract_strided_slice %222 {offsets = [4, 0], sizes = [4, 256], strides = [1, 1]} : vector<8x256xf32> to vector<4x256xf32>
    %280 = vector.extract_strided_slice %228 {offsets = [4, 0], sizes = [4, 256], strides = [1, 1]} : vector<8x256xf32> to vector<4x256xf32>
    %281 = vector.extract_strided_slice %234 {offsets = [4, 0], sizes = [4, 256], strides = [1, 1]} : vector<8x256xf32> to vector<4x256xf32>
    %282 = vector.extract_strided_slice %240 {offsets = [4, 0], sizes = [4, 256], strides = [1, 1]} : vector<8x256xf32> to vector<4x256xf32>
    %283 = vector.extract_strided_slice %243 {offsets = [4, 0], sizes = [4, 256], strides = [1, 1]} : vector<8x256xf32> to vector<4x256xf32>
    %284 = vector.extract_strided_slice %249 {offsets = [4, 0], sizes = [4, 256], strides = [1, 1]} : vector<8x256xf32> to vector<4x256xf32>
    %285 = vector.extract_strided_slice %255 {offsets = [4, 0], sizes = [4, 256], strides = [1, 1]} : vector<8x256xf32> to vector<4x256xf32>
    %286 = vector.extract_strided_slice %261 {offsets = [4, 0], sizes = [4, 256], strides = [1, 1]} : vector<8x256xf32> to vector<4x256xf32>
    %287 = vector.extract_strided_slice %267 {offsets = [4, 0], sizes = [4, 256], strides = [1, 1]} : vector<8x256xf32> to vector<4x256xf32>
    %288 = tpu.concatenate %279, %280, %281, %282, %283, %284, %285, %286, %287 in 0 : vector<4x256xf32>, vector<4x256xf32>, vector<4x256xf32>, vector<4x256xf32>, vector<4x256xf32>, vector<4x256xf32>, vector<4x256xf32>, vector<4x256xf32>, vector<4x256xf32> -> vector<36x256xf32>
    %cst_25 = arith.constant dense<0.000000e+00> : vector<4x256xf32>
    %289 = tpu.matmul %1, %288, %cst_25 {dimension_numbers = #tpu.dot_dimension_numbers<[1], [0], [0], [1], [0, 0, 1, 1], [], []>} : vector<4x36xf32>, vector<36x256xf32>, vector<4x256xf32> -> vector<4x256xf32>
    %290 = tpu.concatenate %278, %289 in 0 : vector<4x256xf32>, vector<4x256xf32> -> vector<8x256xf32>
    %cst_26 = arith.constant dense<0.000000e+00> : vector<8xf32>
    %291 = vector.multi_reduction <add>, %290, %cst_26 [1] : vector<8x256xf32> to vector<8xf32>
    %292 = vector.shape_cast %291 : vector<8xf32> to vector<8x1xf32>
    %293 = arith.mulf %290, %290 : vector<8x256xf32>
    %cst_27 = arith.constant dense<0.000000e+00> : vector<8xf32>
    %294 = vector.multi_reduction <add>, %293, %cst_27 [1] : vector<8x256xf32> to vector<8xf32>
    %295 = vector.shape_cast %294 : vector<8xf32> to vector<8x1xf32>
    %296 = vector.extract_strided_slice %292 {offsets = [0, 0], sizes = [4, 1], strides = [1, 1]} : vector<8x1xf32> to vector<4x1xf32>
    %297 = vector.extract_strided_slice %295 {offsets = [0, 0], sizes = [4, 1], strides = [1, 1]} : vector<8x1xf32> to vector<4x1xf32>
    %298 = vector.extract_strided_slice %292 {offsets = [4, 0], sizes = [4, 1], strides = [1, 1]} : vector<8x1xf32> to vector<4x1xf32>
    %299 = arith.addf %296, %298 : vector<4x1xf32>
    %300 = vector.extract_strided_slice %295 {offsets = [4, 0], sizes = [4, 1], strides = [1, 1]} : vector<8x1xf32> to vector<4x1xf32>
    %301 = arith.addf %297, %300 : vector<4x1xf32>
    %cst_28 = arith.constant 0.001953125 : f32
    %302 = vector.broadcast %cst_28 : f32 to vector<4x1xf32>
    %303 = arith.mulf %299, %302 : vector<4x1xf32>
    %cst_29 = arith.constant 0.001953125 : f32
    %304 = vector.broadcast %cst_29 : f32 to vector<4x1xf32>
    %305 = arith.mulf %301, %304 : vector<4x1xf32>
    %306 = arith.mulf %303, %303 : vector<4x1xf32>
    %307 = arith.subf %305, %306 : vector<4x1xf32>
    %cst_30 = arith.constant 9.99999974E-6 : f32
    %308 = vector.broadcast %cst_30 : f32 to vector<4x1xf32>
    %309 = arith.addf %307, %308 : vector<4x1xf32>
    %310 = math.rsqrt %309 : vector<4x1xf32>
    %311 = arith.mulf %3, %310 : vector<4x1xf32>
    %312 = arith.mulf %303, %311 : vector<4x1xf32>
    %313 = arith.subf %4, %312 : vector<4x1xf32>
    %314 = tpu.concatenate %311, %311 in 0 : vector<4x1xf32>, vector<4x1xf32> -> vector<8x1xf32>
    %315 = tpu.concatenate %313, %313 in 0 : vector<4x1xf32>, vector<4x1xf32> -> vector<8x1xf32>
    %316 = vector.broadcast %314 : vector<8x1xf32> to vector<8x256xf32>
    %317 = arith.mulf %290, %316 : vector<8x256xf32>
    %318 = vector.broadcast %315 : vector<8x1xf32> to vector<8x256xf32>
    %319 = arith.addf %317, %318 : vector<8x256xf32>
    %cst_31 = arith.constant 0.000000e+00 : f32
    %320 = vector.broadcast %cst_31 : f32 to vector<8x256xf32>
    %321 = arith.maximumf %319, %320 : vector<8x256xf32>
    %c0_32 = arith.constant 0 : index
    %c0_33 = arith.constant 0 : index
    %322 = vector.load %arg5[%c0_32, %c0_33] : memref<8x256xf32, #tpu.memory_space<vmem>>, vector<8x256xf32>
    tpu.vector_store %arg5[%c0_32, %c0_33], %321 {strides = array<i32>} : memref<8x256xf32, #tpu.memory_space<vmem>>, vector<8x256xf32>,
    return
  }
}

</mosaic_0001>

<bundles_post_ra>
// kernel: recurrent_block_forward.1
= control target key start
LH: loop header
LB: loop body
LE: loop exit
PB: predicated region body
PF: predicated region fallthrough
CT: control target
= control target key end

     0   :  { %s1055_s20 = smov 113   ;;  %s1056_s21 = smov 111   ;;  %vm123_vm0 = vcmask 916480   ;;  %vm109_vm1 = vcmask 924672   ;;  %vm137_vm2 = vcmask 908288   ;;  %vm171_vm3 = vcmask 1043456   ;;  %s1467_s0 = inlined_call_operand.vmem [shape: f32[8,256], index: 0, kind: input, shape index: {}]   ;;  %s1468_s2 = inlined_call_operand.vmem [shape: f32[9,256], index: 2, kind: input, shape index: {}]   ;;  %s1469_s1 = inlined_call_operand.vmem [shape: f32[4,36], index: 1, kind: input, shape index: {}]   ;;  %s1470_s3 = inlined_call_operand.vmem [shape: f32[4,1], index: 3, kind: input, shape index: {}]   ;;  %s1471_s4 = inlined_call_operand.vmem [shape: f32[4,1], index: 4, kind: input, shape index: {}]   ;;  %s1472_s5 = inlined_call_operand.vmem [shape: f32[8,256], index: 5, kind: output, shape index: {}]  }
   0x1   :  { %v1097_v0 = vld [vmem:[%s1467_s0] sm:$0xff]  ;;  %s1057_s22 = smov 112   ;;  %v1108_v1 = vld [vmem:[%s1467_s0 + $0x8] sm:$0xff]  ;;  %s1058_s25 = smov 15   ;;  %v1165_v16 = vld [vmem:[%s1468_s2 + $0x10] ss:$0 sm:$0xff] }
   0x2   :  { %105 = vrot.lane.b32.xlu1 %v1097_v0, %s1055_s20  ;;  %133 = vrot.lane.b32.xlu0 %v1097_v0, %s1056_s21  ;;  %s1059_s26 = smov 127   ;;  %s1060_s0 = smov 17   ;;  %v1139_v3 = vld [vmem:[%s1468_s2] sm:$0xff]  ;;  %v1144_v4 = vld [vmem:[%s1468_s2 + $0x8] sm:$0xff]  ;;  %vm95_vm4 = vcmask 1039360   ;;  %vm64_vm5 = vcmask 121856  }
   0x3   :  { %119 = vrot.lane.b32.xlu2 %v1097_v0, %s1057_s22  ;;  %s1061_s27 = smov 1   ;;  %s1062_s28 = smov 16   ;;  %v1147_v8 = vperm.slane %v1139_v3, 7  ;;  %v1150_v9 = vperm.slane %v1144_v4, 7  ;;  %v1157_v14 = vperm.slane %v1139_v3, 6  ;;  %v1160_v15 = vperm.slane %v1144_v4, 6 }
   0x4   :  { %v1170_v17 = vld [vmem:[%s1468_s2 + $0x18] ss:$0 sm:$0xff]  ;;  %v1189_v40 = vperm.slane %v1139_v3, 4  ;;  %v1192_v41 = vperm.slane %v1144_v4, 4  ;;  %v1199_v45 = vperm.slane %v1139_v3, 5  ;;  %v1202_v46 = vperm.slane %v1144_v4, 5 }
   0x5   :  { %v1207_v53 = vperm.slane %v1139_v3, 2  ;;  %v1210_v54 = vperm.slane %v1144_v4, 2  ;;  %vm78_vm6 = vcmask 7168   ;;  %v1219_v63 = vperm.slane %v1139_v3, 3 }
   0x6   :  { %v89_v43 = vmul.f32 %v1189_v40, %v1097_v0  ;;  %v90_v44 = vmul.f32 %v1192_v41, %v1108_v1  ;;  %vm36_vm7 = vcmask 138240   ;;  %vm50_vm8 = vcmask 130048  }
   0x7   :  { %vm180_vm9 = vcmask 293888  }
   0x8   :  { %v244_v49 = vrot.slane %v89_v43, 4  ;;  %v245_v50 = vrot.slane %v90_v44, 4 }
   0xa   :  { %107 = vrot.lane.b32.xlu1 %v1108_v1, %s1055_s20  ;;  %135 = vrot.lane.b32.xlu0 %v1108_v1, %s1056_s21 }
   0xb   :  { %121 = vrot.lane.b32.xlu2 %v1108_v1, %s1057_s22 }
  0x12   :  { %62 = vrot.lane.b32.xlu1 %v1097_v0, %s1058_s25  ;;  %59 = vrot.lane.b32.xlu0 %v1108_v1, %s1058_s25 }
  0x13   :  { %91 = vrot.lane.b32.xlu2 %v1097_v0, %s1059_s26 }
  0x1a   :  { %30 = vrot.lane.b32.xlu1 %v1108_v1, %s1060_s0  ;;  %93 = vrot.lane.b32.xlu0 %v1108_v1, %s1059_s26 }
  0x1b   :  { %34 = vrot.lane.b32.xlu2 %v1097_v0, %s1060_s0 }
  0x22   :  { %76 = vrot.lane.b32.xlu1 %v1097_v0, %s1061_s27  ;;  %73 = vrot.lane.b32.xlu0 %v1108_v1, %s1061_s27 }
  0x23   :  { %45 = vrot.lane.b32.xlu2 %v1108_v1, %s1062_s28 }
  0x2a   :  { %48 = vrot.lane.b32.xlu0 %v1097_v0, %s1062_s28 }
  0x5d   :  { %v120_v2 = vpop.permute.xlu2 %119 }
  0x65   :  { %v122_v5 = vpop.permute.xlu2 %121 }
  0x66   :  { %v124_v10 = vsel %vm123_vm0, %v120_v2, %v122_v5  ;;  %v128_v11 = vsel %vm123_vm0, %v122_v5, %v120_v2  ;;  %v1222_v2 = vperm.slane %v1144_v4, 3 }
  0x67   :  { %v131_v12 = vmul.f32 %v1147_v8, %v124_v10  ;;  %v132_v13 = vmul.f32 %v1150_v9, %v128_v11 }
  0x69   :  { %v167_v18 = vrot.slane %v131_v12, 4  ;;  %v168_v19 = vrot.slane %v132_v13, 4 }
  0x6d   :  { %v92_v42 = vpop.permute.xlu2 %91 }
  0x74   :  { %v106_v6 = vpop.permute.xlu1 %105  ;;  %v134_v7 = vpop.permute.xlu0 %133 }
  0x7c   :  { %v108_v20 = vpop.permute.xlu1 %107  ;;  %v136_v21 = vpop.permute.xlu0 %135 }
  0x7d   :  { %v110_v22 = vsel %vm109_vm1, %v106_v6, %v108_v20  ;;  %v114_v23 = vsel %vm109_vm1, %v108_v20, %v106_v6  ;;  %v138_v24 = vsel %vm137_vm2, %v134_v7, %v136_v21  ;;  %v142_v25 = vsel %vm137_vm2, %v136_v21, %v134_v7  ;;  %v35_v7 = vpop.permute.xlu2 %34 }
  0x7e   :  { %v117_v26 = vmul.f32 %v1157_v14, %v110_v22  ;;  %v118_v27 = vmul.f32 %v1160_v15, %v114_v23  ;;  %v145_v28 = vmul.f32 %v1165_v16, %v138_v24  ;;  %v146_v29 = vmul.f32 %v1170_v17, %v142_v25 }
  0x80   :  { %v250_v30 = vrot.slane %v117_v26, 4  ;;  %v251_v31 = vrot.slane %v118_v27, 4  ;;  %1012 = vmatpush.msk.msra.mxu0 %vm171_vm3, %v145_v28  ;;  %1014 = vmatpush.msk.msra.mxu1 %vm171_vm3, %v146_v29  ;;  %v178_v32 = vsel %vm171_vm3, %v117_v26, %v167_v18  ;;  %v179_v33 = vsel %vm171_vm3, %v118_v27, %v168_v19 }
  0x81   :  { %v254_v34 = vrot.slane %v145_v28, 4  ;;  %v255_v35 = vrot.slane %v146_v29, 4  ;;  %v1229_v18 = vperm.slane %v1139_v3, 0  ;;  %v1232_v19 = vperm.slane %v1144_v4, 0 }
  0x82   :  { %202 = vmatpush.msra.mxu0 %v178_v32  ;;  %222 = vmatpush.msra.mxu1 %v179_v33  ;;  %v262_v36 = vsel %vm171_vm3, %v250_v30, %v131_v12  ;;  %v263_v37 = vsel %vm171_vm3, %v251_v31, %v132_v13  ;;  %v1243_v32 = vperm.slane %v1139_v3, 1  ;;  %v1246_v33 = vperm.slane %v1144_v4, 1 }
  0x83   :  { %1016 = vmatpush.msk.msra.mxu2 %vm171_vm3, %v254_v34  ;;  %1018 = vmatpush.msk.msra.mxu3 %vm171_vm3, %v255_v35 }
  0x84   :  { %v63_v38 = vpop.permute.xlu1 %62  ;;  %v60_v39 = vpop.permute.xlu0 %59 }
  0x85   :  { %280 = vmatpush.msra.mxu2 %v262_v36  ;;  %300 = vmatpush.msra.mxu3 %v263_v37  ;;  %v65_v57 = vsel %vm64_vm5, %v63_v38, %v60_v39  ;;  %v68_v58 = vsel %vm64_vm5, %v60_v39, %v63_v38  ;;  %v46_v38 = vpop.permute.xlu2 %45 }
  0x86   :  { %v71_v5 = vmul.f32 %v1207_v53, %v68_v58  ;;  %v72_v6 = vmul.f32 %v1210_v54, %v65_v57 }
  0x88   :  { %v238_v22 = vrot.slane %v71_v5, 4  ;;  %v239_v23 = vrot.slane %v72_v6, 4 }
  0x8c   :  { %v31_v47 = vpop.permute.xlu1 %30  ;;  %v94_v48 = vpop.permute.xlu0 %93 }
  0x8d   :  { %v96_v51 = vsel %vm95_vm4, %v92_v42, %v94_v48  ;;  %v100_v52 = vsel %vm95_vm4, %v94_v48, %v92_v42  ;;  %v37_v26 = vsel %vm36_vm7, %v35_v7, %v31_v47  ;;  %v40_v27 = vsel %vm36_vm7, %v31_v47, %v35_v7  ;;  %v1259_v48 = vld [vmem:[%s1469_s1] sm:$0xf] }
  0x8e   :  { %v103_v55 = vmul.f32 %v1199_v45, %v96_v51  ;;  %v104_v56 = vmul.f32 %v1202_v46, %v100_v52  ;;  %v43_v34 = vmul.f32 %v1229_v18, %v40_v27  ;;  %v44_v35 = vmul.f32 %v1232_v19, %v37_v26 }
  0x90   :  { %v161_v59 = vrot.slane %v103_v55, 4  ;;  %v162_v60 = vrot.slane %v104_v56, 4  ;;  %v260_v61 = vsel %vm171_vm3, %v244_v49, %v103_v55  ;;  %v261_v62 = vsel %vm171_vm3, %v245_v50, %v104_v56 }
  0x91   :  { %281 = vmatpush.msra.mxu2 %v260_v61  ;;  %301 = vmatpush.msra.mxu3 %v261_v62 }
  0x92   :  { %v176_v10 = vsel %vm171_vm3, %v89_v43, %v161_v59  ;;  %v177_v11 = vsel %vm171_vm3, %v90_v44, %v162_v60  ;;  %v232_v43 = vrot.slane %v43_v34, 4  ;;  %v233_v44 = vrot.slane %v44_v35, 4 }
  0x93   :  { %203 = vmatpush.msra.mxu0 %v176_v10  ;;  %223 = vmatpush.msra.mxu1 %v177_v11 }
  0x94   :  { %v77_v12 = vpop.permute.xlu1 %76  ;;  %v74_v13 = vpop.permute.xlu0 %73 }
  0x95   :  { %v79_v20 = vsel %vm78_vm6, %v77_v12, %v74_v13  ;;  %v82_v21 = vsel %vm78_vm6, %v74_v13, %v77_v12  ;;  %v1063_v13 = vmov 0  }
  0x96   :  { %v85_v24 = vmul.f32 %v1219_v63, %v82_v21  ;;  %v86_v25 = vmul.f32 %v1222_v2, %v79_v20  ;;  %1045 = vset.pattern.permute.xlu0 %v1063_v13  ;;  %1046 = vset.pattern.permute.xlu1 %v1063_v13 }
  0x98   :  { %v155_v28 = vrot.slane %v85_v24, 4  ;;  %v156_v29 = vrot.slane %v86_v25, 4  ;;  %v258_v30 = vsel %vm171_vm3, %v238_v22, %v85_v24  ;;  %v259_v31 = vsel %vm171_vm3, %v239_v23, %v86_v25 }
  0x99   :  { %282 = vmatpush.msra.mxu2 %v258_v30  ;;  %302 = vmatpush.msra.mxu3 %v259_v31 }
  0x9a   :  { %v174_v36 = vsel %vm171_vm3, %v71_v5, %v155_v28  ;;  %v175_v37 = vsel %vm171_vm3, %v72_v6, %v156_v29 }
  0x9b   :  { %204 = vmatpush.msra.mxu0 %v174_v36  ;;  %224 = vmatpush.msra.mxu1 %v175_v37 }
  0x9c   :  { %v49_v39 = vpop.permute.xlu0 %48 }
  0x9d   :  { %v51_v42 = vsel %vm50_vm8, %v49_v39, %v46_v38  ;;  %v54_v3 = vsel %vm50_vm8, %v46_v38, %v49_v39  ;;  %v1278_v38 = vld [vmem:[%s1470_s3] sm:$0xf] }
  0x9e   :  { %v57_v4 = vmul.f32 %v1243_v32, %v54_v3  ;;  %v58_v47 = vmul.f32 %v1246_v33, %v51_v42 }
  0xa0   :  { %v149_v49 = vrot.slane %v57_v4, 4  ;;  %v150_v50 = vrot.slane %v58_v47, 4  ;;  %v256_v51 = vsel %vm171_vm3, %v232_v43, %v57_v4  ;;  %v257_v52 = vsel %vm171_vm3, %v233_v44, %v58_v47  ;;  %v1284_v43 = vld [vmem:[%s1471_s4] sm:$0xf] }
  0xa1   :  { %283 = vmatpush.msra.mxu2 %v256_v51  ;;  %303 = vmatpush.msra.mxu3 %v257_v52 }
  0xa2   :  { %1017 = vmatmul.msk.f32.vlgmr.msra.gmra.mxu2 %vm180_vm9, %v1259_v48  ;;  %1019 = vmatmul.msk.f32.vlgmr.msra.gmra.mxu3 %vm180_vm9, %v1259_v48  ;;  %v172_v55 = vsel %vm171_vm3, %v43_v34, %v149_v49  ;;  %v173_v56 = vsel %vm171_vm3, %v44_v35, %v150_v50 }
  0xa3   :  { %205 = vmatpush.msra.mxu0 %v172_v55  ;;  %225 = vmatpush.msra.mxu1 %v173_v56 }
  0xa4   :  { %1013 = vmatmul.msk.f32.vlgmr.msra.gmra.mxu0 %vm180_vm9, %v1259_v48  ;;  %1015 = vmatmul.msk.f32.vlgmr.msra.gmra.mxu1 %vm180_vm9, %v1259_v48 }
 0x121   :  { %v207_v57 = vpop.f32.mrf.mxu0  ;;  %v227_v58 = vpop.f32.mrf.mxu1 }
 0x125   :  { %v285_v59 = vpop.f32.mrf.mxu2  ;;  %v305_v60 = vpop.f32.mrf.mxu3 }
 0x126   :  { %v310_v61 = vrot.slane %v285_v59, 4  ;;  %v311_v62 = vrot.slane %v305_v60, 4 }
 0x128   :  { %v314_v5 = vsel %vm171_vm3, %v207_v57, %v310_v61  ;;  %v315_v6 = vsel %vm171_vm3, %v227_v58, %v311_v62 }
 0x129   :  { %v316_v7 = vadd.f32 %v315_v6, %v314_v5  ;;  %v319_v10 = vmul.f32 %v314_v5, %v314_v5  ;;  %v320_v11 = vmul.f32 %v315_v6, %v315_v6 }
 0x12b   :  { %317 = vadd.xlane.f32.xlu1 %v316_v7  ;;  %v321_v12 = vadd.f32 %v320_v11, %v319_v10 }
 0x12d   :  { %322 = vadd.xlane.f32.xlu2 %v321_v12 }
 0x19e   :  { %v318_v20 = vpop.xlane.xlu1 %317 }
 0x19f   :  { %v325_v21 = vrot.slane %v318_v20, 4 }
 0x1a0   :  { %v323_v22 = vpop.xlane.xlu2 %322 }
 0x1a1   :  { %v327_v23 = vadd.f32 %v325_v21, %v318_v20  ;;  %v329_v24 = vrot.slane %v323_v22, 4 }
 0x1a3   :  { %v332_v25 = vmul.f32 0.001953125, %v327_v23  ;;  %v331_v26 = vadd.f32 %v329_v24, %v323_v22 }
 0x1a5   :  { %v334_v27 = vmul.f32 %v332_v25, %v332_v25  ;;  %v333_v28 = vmul.f32 0.001953125, %v331_v26 }
 0x1a7   :  { %v335_v29 = vsub.f32 %v333_v28, %v334_v27 }
 0x1a9   :  { %v336_v30 = vadd.f32 1e-05, %v335_v29 }
 0x1ab   :  { %1049 = vrsqrt.f32 %v336_v30  ;;  %vm343_vm11 = vweird.f32 %v336_v30 }
 0x1b1   :  { %v1050_v31 = vpop.eup %1049 }
 0x1b2   :  { %v338_v34 = vmul.f32 %v1050_v31, %v336_v30  ;;  %vm344_vm10 = vweird.f32 %v1050_v31 }
 0x1b3   :  { %vm345_vm12 = vmor %vm343_vm11, %vm344_vm10 }
 0x1b4   :  { %v339_v35 = vmul.f32 %v1050_v31, %v338_v34 }
 0x1b6   :  { %v340_v36 = vmul.f32 0.5, %v339_v35 }
 0x1b8   :  { %v341_v37 = vsub.f32 1.5, %v340_v36 }
 0x1ba   :  { %v342_v39 = vmul.f32 %v1050_v31, %v341_v37 }
 0x1bc   :  { %v346_v42 = vsel %vm345_vm12, %v1050_v31, %v342_v39 }
 0x1bd   :  { %v347_v3 = vmul.f32 %v346_v42, %v1278_v38 }
 0x1bf   :  { %v351_v44 = vrot.slane %v347_v3, 4  ;;  %v348_v4 = vmul.f32 %v347_v3, %v332_v25 }
 0x1c1   :  { %v353_v47 = vsel %vm171_vm3, %v347_v3, %v351_v44  ;;  %v349_v49 = vsub.f32 %v1284_v43, %v348_v4 }
 0x1c2   :  { %360 = vperm.xlu0 %1045, %v353_v47  }
 0x1c3   :  { %v355_v50 = vrot.slane %v349_v49, 4 }
 0x1c5   :  { %v357_v51 = vsel %vm171_vm3, %v349_v49, %v355_v50 }
 0x1ca   :  { %367 = vperm.xlu0 %1045, %v357_v51  }
 0x234   :  { %v361_v52 = vpop.permute.xlu0 %360 }
 0x235   :  { %v363_v55 = vmul.f32 %v361_v52, %v314_v5  ;;  %v364_v56 = vmul.f32 %v361_v52, %v315_v6 }
 0x23c   :  { %v368_v57 = vpop.permute.xlu0 %367 }
 0x23d   :  { %v370_v58 = vadd.f32 %v368_v57, %v363_v55  ;;  %v371_v59 = vadd.f32 %v368_v57, %v364_v56 }
 0x23f   :  { %v372_v60 = vmax.f32 %v370_v58, 0.0  ;;  %v373_v61 = vmax.f32 %v371_v59, 0.0 }
 0x241   :  { %v374_v62 = vadd.f32 %v372_v60, %v1097_v0  ;;  %v375_v7 = vadd.f32 %v373_v61, %v1108_v1 }
 0x243   :  { %437 = vrot.lane.b32.xlu1 %v375_v7, %s1055_s20  ;;  %435 = vrot.lane.b32.xlu2 %v374_v62, %s1055_s20  ;;  %v422_v55 = vmul.f32 %v374_v62, %v1189_v40  ;;  %v423_v56 = vmul.f32 %v375_v7, %v1192_v41 }
 0x244   :  { %457 = vrot.lane.b32.xlu0 %v374_v62, %s1056_s21 }
 0x24b   :  { %424 = vrot.lane.b32.xlu1 %v374_v62, %s1059_s26  ;;  %403 = vrot.lane.b32.xlu2 %v374_v62, %s1058_s25 }
 0x24c   :  { %459 = vrot.lane.b32.xlu0 %v375_v7, %s1056_s21 }
 0x253   :  { %381 = vrot.lane.b32.xlu1 %v374_v62, %s1060_s0  ;;  %377 = vrot.lane.b32.xlu2 %v375_v7, %s1060_s0 }
 0x254   :  { %446 = vrot.lane.b32.xlu0 %v374_v62, %s1057_s22 }
 0x25b   :  { %389 = vrot.lane.b32.xlu1 %v375_v7, %s1062_s28  ;;  %414 = vrot.lane.b32.xlu2 %v374_v62, %s1061_s27 }
 0x25c   :  { %448 = vrot.lane.b32.xlu0 %v375_v7, %s1057_s22 }
 0x264   :  { %400 = vrot.lane.b32.xlu0 %v375_v7, %s1058_s25 }
 0x26c   :  { %426 = vrot.lane.b32.xlu0 %v375_v7, %s1059_s26 }
 0x274   :  { %411 = vrot.lane.b32.xlu0 %v375_v7, %s1061_s27 }
 0x27c   :  { %392 = vrot.lane.b32.xlu0 %v374_v62, %s1062_s28 }
 0x29d   :  { %v436_v24 = vpop.permute.xlu2 %435 }
 0x2a5   :  { %v404_v39 = vpop.permute.xlu2 %403 }
 0x2ad   :  { %v378_v52 = vpop.permute.xlu2 %377 }
 0x2b5   :  { %v438_v22 = vpop.permute.xlu1 %437 }
 0x2b6   :  { %v458_v5 = vpop.permute.xlu0 %457  ;;  %v439_v25 = vsel %vm109_vm1, %v436_v24, %v438_v22  ;;  %v443_v26 = vsel %vm109_vm1, %v438_v22, %v436_v24 }
 0x2b7   :  { %v444_v27 = vmul.f32 %v439_v25, %v1157_v14  ;;  %v445_v28 = vmul.f32 %v443_v26, %v1160_v15  ;;  %v415_v25 = vpop.permute.xlu2 %414 }
 0x2b9   :  { %v566_v34 = vrot.slane %v444_v27, 4  ;;  %v567_v35 = vrot.slane %v445_v28, 4 }
 0x2bd   :  { %v425_v51 = vpop.permute.xlu1 %424 }
 0x2be   :  { %v460_v6 = vpop.permute.xlu0 %459 }
 0x2bf   :  { %v461_v10 = vsel %vm137_vm2, %v458_v5, %v460_v6  ;;  %v465_v11 = vsel %vm137_vm2, %v460_v6, %v458_v5  ;;  %v560_v5 = vrot.slane %v422_v55, 4  ;;  %v561_v6 = vrot.slane %v423_v56, 4 }
 0x2c0   :  { %v466_v12 = vmul.f32 %v1165_v16, %v461_v10  ;;  %v467_v13 = vmul.f32 %v1170_v17, %v465_v11 }
 0x2c2   :  { %1020 = vmatpush.msk.msrb.mxu0 %vm171_vm3, %v466_v12  ;;  %1022 = vmatpush.msk.msrb.mxu1 %vm171_vm3, %v467_v13  ;;  %v570_v20 = vrot.slane %v466_v12, 4  ;;  %v571_v21 = vrot.slane %v467_v13, 4 }
 0x2c4   :  { %1024 = vmatpush.msk.msrb.mxu2 %vm171_vm3, %v570_v20  ;;  %1026 = vmatpush.msk.msrb.mxu3 %vm171_vm3, %v571_v21 }
 0x2c5   :  { %v382_v20 = vpop.permute.xlu1 %381 }
 0x2c6   :  { %v447_v23 = vpop.permute.xlu0 %446 }
 0x2ce   :  { %v449_v29 = vpop.permute.xlu0 %448 }
 0x2cf   :  { %v450_v30 = vsel %vm123_vm0, %v447_v23, %v449_v29  ;;  %v454_v31 = vsel %vm123_vm0, %v449_v29, %v447_v23 }
 0x2d0   :  { %v455_v36 = vmul.f32 %v450_v30, %v1147_v8  ;;  %v456_v37 = vmul.f32 %v454_v31, %v1150_v9 }
 0x2d2   :  { %v488_v42 = vrot.slane %v455_v36, 4  ;;  %v489_v3 = vrot.slane %v456_v37, 4  ;;  %v578_v44 = vsel %vm171_vm3, %v566_v34, %v455_v36  ;;  %v579_v4 = vsel %vm171_vm3, %v567_v35, %v456_v37 }
 0x2d3   :  { %596 = vmatpush.msrb.mxu2 %v578_v44  ;;  %616 = vmatpush.msrb.mxu3 %v579_v4  ;;  %v383_v35 = vsel %vm36_vm7, %v382_v20, %v378_v52  ;;  %v386_v36 = vsel %vm36_vm7, %v378_v52, %v382_v20 }
 0x2d4   :  { %v498_v47 = vsel %vm171_vm3, %v444_v27, %v488_v42  ;;  %v499_v49 = vsel %vm171_vm3, %v445_v28, %v489_v3  ;;  %v387_v44 = vmul.f32 %v386_v36, %v1229_v18  ;;  %v388_v4 = vmul.f32 %v383_v35, %v1232_v19 }
 0x2d5   :  { %518 = vmatpush.msrb.mxu0 %v498_v47  ;;  %538 = vmatpush.msrb.mxu1 %v499_v49 }
 0x2d6   :  { %v401_v50 = vpop.permute.xlu0 %400 }
 0x2d7   :  { %v405_v10 = vsel %vm64_vm5, %v404_v39, %v401_v50  ;;  %v408_v11 = vsel %vm64_vm5, %v401_v50, %v404_v39  ;;  %v390_v50 = vpop.permute.xlu1 %389 }
 0x2d8   :  { %v409_v21 = vmul.f32 %v408_v11, %v1207_v53  ;;  %v410_v22 = vmul.f32 %v405_v10, %v1210_v54 }
 0x2da   :  { %v554_v29 = vrot.slane %v409_v21, 4  ;;  %v555_v30 = vrot.slane %v410_v22, 4 }
 0x2de   :  { %v427_v57 = vpop.permute.xlu0 %426 }
 0x2df   :  { %v428_v58 = vsel %vm95_vm4, %v425_v51, %v427_v57  ;;  %v432_v59 = vsel %vm95_vm4, %v427_v57, %v425_v51  ;;  %v549_v57 = vrot.slane %v388_v4, 4 }
 0x2e0   :  { %v433_v60 = vmul.f32 %v428_v58, %v1199_v45  ;;  %v434_v61 = vmul.f32 %v432_v59, %v1202_v46 }
 0x2e2   :  { %v482_v12 = vrot.slane %v433_v60, 4  ;;  %v483_v13 = vrot.slane %v434_v61, 4  ;;  %v576_v62 = vsel %vm171_vm3, %v560_v5, %v433_v60  ;;  %v577_v7 = vsel %vm171_vm3, %v561_v6, %v434_v61 }
 0x2e3   :  { %597 = vmatpush.msrb.mxu2 %v576_v62  ;;  %617 = vmatpush.msrb.mxu3 %v577_v7 }
 0x2e4   :  { %v496_v23 = vsel %vm171_vm3, %v422_v55, %v482_v12  ;;  %v497_v24 = vsel %vm171_vm3, %v423_v56, %v483_v13  ;;  %v548_v56 = vrot.slane %v387_v44, 4 }
 0x2e5   :  { %519 = vmatpush.msrb.mxu0 %v496_v23  ;;  %539 = vmatpush.msrb.mxu1 %v497_v24 }
 0x2e6   :  { %v412_v26 = vpop.permute.xlu0 %411 }
 0x2e7   :  { %v416_v27 = vsel %vm78_vm6, %v415_v25, %v412_v26  ;;  %v419_v28 = vsel %vm78_vm6, %v412_v26, %v415_v25 }
 0x2e8   :  { %v420_v31 = vmul.f32 %v419_v28, %v1219_v63  ;;  %v421_v34 = vmul.f32 %v416_v27, %v1222_v2 }
 0x2ea   :  { %v476_v37 = vrot.slane %v420_v31, 4  ;;  %v477_v39 = vrot.slane %v421_v34, 4  ;;  %v574_v42 = vsel %vm171_vm3, %v554_v29, %v420_v31  ;;  %v575_v3 = vsel %vm171_vm3, %v555_v30, %v421_v34 }
 0x2eb   :  { %598 = vmatpush.msrb.mxu2 %v574_v42  ;;  %618 = vmatpush.msrb.mxu3 %v575_v3 }
 0x2ec   :  { %v494_v47 = vsel %vm171_vm3, %v409_v21, %v476_v37  ;;  %v495_v49 = vsel %vm171_vm3, %v410_v22, %v477_v39 }
 0x2ed   :  { %520 = vmatpush.msrb.mxu0 %v494_v47  ;;  %540 = vmatpush.msrb.mxu1 %v495_v49 }
 0x2ee   :  { %v393_v51 = vpop.permute.xlu0 %392 }
 0x2ef   :  { %v394_v52 = vsel %vm50_vm8, %v393_v51, %v390_v50  ;;  %v397_v55 = vsel %vm50_vm8, %v390_v50, %v393_v51 }
 0x2f0   :  { %v398_v58 = vmul.f32 %v397_v55, %v1243_v32  ;;  %v399_v59 = vmul.f32 %v394_v52, %v1246_v33 }
 0x2f2   :  { %v470_v60 = vrot.slane %v398_v58, 4  ;;  %v471_v61 = vrot.slane %v399_v59, 4  ;;  %v572_v5 = vsel %vm171_vm3, %v548_v56, %v398_v58  ;;  %v573_v6 = vsel %vm171_vm3, %v549_v57, %v399_v59 }
 0x2f3   :  { %599 = vmatpush.msrb.mxu2 %v572_v5  ;;  %619 = vmatpush.msrb.mxu3 %v573_v6 }
 0x2f4   :  { %1025 = vmatmul.msk.f32.vlgmr.msrb.gmra.mxu2 %vm180_vm9, %v1259_v48  ;;  %1027 = vmatmul.msk.f32.vlgmr.msrb.gmra.mxu3 %vm180_vm9, %v1259_v48  ;;  %v492_v10 = vsel %vm171_vm3, %v387_v44, %v470_v60  ;;  %v493_v11 = vsel %vm171_vm3, %v388_v4, %v471_v61 }
 0x2f5   :  { %521 = vmatpush.msrb.mxu0 %v492_v10  ;;  %541 = vmatpush.msrb.mxu1 %v493_v11 }
 0x2f6   :  { %1021 = vmatmul.msk.f32.vlgmr.msrb.gmra.mxu0 %vm180_vm9, %v1259_v48  ;;  %1023 = vmatmul.msk.f32.vlgmr.msrb.gmra.mxu1 %vm180_vm9, %v1259_v48 }
 0x373   :  { %v523_v12 = vpop.f32.mrf.mxu0  ;;  %v543_v13 = vpop.f32.mrf.mxu1 }
 0x377   :  { %v601_v62 = vpop.f32.mrf.mxu2  ;;  %v621_v7 = vpop.f32.mrf.mxu3 }
 0x378   :  { %v626_v20 = vrot.slane %v601_v62, 4  ;;  %v627_v21 = vrot.slane %v621_v7, 4 }
 0x37a   :  { %v630_v22 = vsel %vm171_vm3, %v523_v12, %v626_v20  ;;  %v631_v23 = vsel %vm171_vm3, %v543_v13, %v627_v21 }
 0x37b   :  { %v632_v24 = vadd.f32 %v631_v23, %v630_v22  ;;  %v635_v25 = vmul.f32 %v630_v22, %v630_v22  ;;  %v636_v26 = vmul.f32 %v631_v23, %v631_v23 }
 0x37d   :  { %633 = vadd.xlane.f32.xlu2 %v632_v24  ;;  %v637_v27 = vadd.f32 %v636_v26, %v635_v25 }
 0x37f   :  { %638 = vadd.xlane.f32.xlu1 %v637_v27 }
 0x3f0   :  { %v634_v28 = vpop.xlane.xlu2 %633 }
 0x3f1   :  { %v641_v29 = vrot.slane %v634_v28, 4 }
 0x3f2   :  { %v639_v30 = vpop.xlane.xlu1 %638 }
 0x3f3   :  { %v643_v31 = vadd.f32 %v641_v29, %v634_v28  ;;  %v645_v34 = vrot.slane %v639_v30, 4 }
 0x3f5   :  { %v648_v35 = vmul.f32 0.001953125, %v643_v31  ;;  %v647_v36 = vadd.f32 %v645_v34, %v639_v30 }
 0x3f7   :  { %v650_v37 = vmul.f32 %v648_v35, %v648_v35  ;;  %v649_v39 = vmul.f32 0.001953125, %v647_v36 }
 0x3f9   :  { %v651_v42 = vsub.f32 %v649_v39, %v650_v37 }
 0x3fb   :  { %v652_v3 = vadd.f32 1e-05, %v651_v42 }
 0x3fd   :  { %1051 = vrsqrt.f32 %v652_v3  ;;  %vm659_vm14 = vweird.f32 %v652_v3 }
 0x403   :  { %v1052_v44 = vpop.eup %1051 }
 0x404   :  { %v654_v4 = vmul.f32 %v1052_v44, %v652_v3  ;;  %vm660_vm13 = vweird.f32 %v1052_v44 }
 0x405   :  { %vm661_vm15 = vmor %vm659_vm14, %vm660_vm13 }
 0x406   :  { %v655_v47 = vmul.f32 %v1052_v44, %v654_v4 }
 0x408   :  { %v656_v49 = vmul.f32 0.5, %v655_v47 }
 0x40a   :  { %v657_v50 = vsub.f32 1.5, %v656_v49 }
 0x40c   :  { %v658_v51 = vmul.f32 %v1052_v44, %v657_v50 }
 0x40e   :  { %v662_v52 = vsel %vm661_vm15, %v1052_v44, %v658_v51 }
 0x40f   :  { %v663_v55 = vmul.f32 %v662_v52, %v1278_v38 }
 0x411   :  { %v667_v56 = vrot.slane %v663_v55, 4  ;;  %v664_v57 = vmul.f32 %v663_v55, %v648_v35 }
 0x413   :  { %v669_v58 = vsel %vm171_vm3, %v663_v55, %v667_v56  ;;  %v665_v59 = vsub.f32 %v1284_v43, %v664_v57 }
 0x414   :  { %676 = vperm.xlu0 %1045, %v669_v58  }
 0x415   :  { %v671_v60 = vrot.slane %v665_v59, 4 }
 0x417   :  { %v673_v61 = vsel %vm171_vm3, %v665_v59, %v671_v60 }
 0x41c   :  { %683 = vperm.xlu0 %1045, %v673_v61  }
 0x486   :  { %v677_v5 = vpop.permute.xlu0 %676 }
 0x487   :  { %v679_v6 = vmul.f32 %v677_v5, %v630_v22  ;;  %v680_v10 = vmul.f32 %v677_v5, %v631_v23 }
 0x48e   :  { %v684_v11 = vpop.permute.xlu0 %683 }
 0x48f   :  { %v686_v12 = vadd.f32 %v684_v11, %v679_v6  ;;  %v687_v13 = vadd.f32 %v684_v11, %v680_v10 }
 0x491   :  { %v688_v62 = vmax.f32 %v686_v12, 0.0  ;;  %v689_v7 = vmax.f32 %v687_v13, 0.0 }
 0x493   :  { %v690_v20 = vadd.f32 %v688_v62, %v1097_v0  ;;  %v691_v21 = vadd.f32 %v689_v7, %v1108_v1 }
 0x495   :  { %753 = vrot.lane.b32.xlu2 %v691_v21, %s1055_s20  ;;  %762 = vrot.lane.b32.xlu1 %v690_v20, %s1057_s22  ;;  %v738_v49 = vmul.f32 %v690_v20, %v1189_v40  ;;  %v739_v50 = vmul.f32 %v691_v21, %v1192_v41 }
 0x496   :  { %773 = vrot.lane.b32.xlu0 %v690_v20, %s1056_s21 }
 0x497   :  { %v876_v59 = vrot.slane %v738_v49, 4  ;;  %v877_v40 = vrot.slane %v739_v50, 4 }
 0x49d   :  { %740 = vrot.lane.b32.xlu2 %v690_v20, %s1059_s26  ;;  %742 = vrot.lane.b32.xlu1 %v691_v21, %s1059_s26 }
 0x49e   :  { %775 = vrot.lane.b32.xlu0 %v691_v21, %s1056_s21 }
 0x4a5   :  { %697 = vrot.lane.b32.xlu2 %v690_v20, %s1060_s0  ;;  %727 = vrot.lane.b32.xlu1 %v691_v21, %s1061_s27 }
 0x4a6   :  { %751 = vrot.lane.b32.xlu0 %v690_v20, %s1055_s20 }
 0x4ad   :  { %705 = vrot.lane.b32.xlu2 %v691_v21, %s1062_s28  ;;  %708 = vrot.lane.b32.xlu1 %v690_v20, %s1062_s28 }
 0x4ae   :  { %764 = vrot.lane.b32.xlu0 %v691_v21, %s1057_s22 }
 0x4b6   :  { %716 = vrot.lane.b32.xlu0 %v691_v21, %s1058_s25 }
 0x4be   :  { %719 = vrot.lane.b32.xlu0 %v690_v20, %s1058_s25 }
 0x4c6   :  { %693 = vrot.lane.b32.xlu0 %v691_v21, %s1060_s0 }
 0x4ce   :  { %730 = vrot.lane.b32.xlu0 %v690_v20, %s1061_s27 }
 0x4ef   :  { %v754_v23 = vpop.permute.xlu2 %753 }
 0x4f7   :  { %v741_v34 = vpop.permute.xlu2 %740 }
 0x4ff   :  { %v698_v12 = vpop.permute.xlu2 %697 }
 0x507   :  { %v763_v1 = vpop.permute.xlu1 %762 }
 0x508   :  { %v774_v0 = vpop.permute.xlu0 %773 }
 0x50f   :  { %v743_v31 = vpop.permute.xlu1 %742 }
 0x510   :  { %v776_v22 = vpop.permute.xlu0 %775 }
 0x511   :  { %v777_v24 = vsel %vm137_vm2, %v774_v0, %v776_v22  ;;  %v781_v25 = vsel %vm137_vm2, %v776_v22, %v774_v0 }
 0x512   :  { %v782_v26 = vmul.f32 %v1165_v16, %v777_v24  ;;  %v783_v27 = vmul.f32 %v1170_v17, %v781_v25  ;;  %v744_v16 = vsel %vm95_vm4, %v741_v34, %v743_v31  ;;  %v748_v17 = vsel %vm95_vm4, %v743_v31, %v741_v34 }
 0x513   :  { %v749_v42 = vmul.f32 %v744_v16, %v1199_v45  ;;  %v750_v3 = vmul.f32 %v748_v17, %v1202_v46 }
 0x514   :  { %v886_v28 = vrot.slane %v782_v26, 4  ;;  %v887_v29 = vrot.slane %v783_v27, 4  ;;  %1028 = vmatpush.msk.msra.mxu0 %vm171_vm3, %v782_v26  ;;  %1030 = vmatpush.msk.msra.mxu1 %vm171_vm3, %v783_v27 }
 0x515   :  { %v799_v56 = vrot.slane %v750_v3, 4 }
 0x516   :  { %1032 = vmatpush.msk.msra.mxu2 %vm171_vm3, %v886_v28  ;;  %1034 = vmatpush.msk.msra.mxu3 %vm171_vm3, %v887_v29 }
 0x517   :  { %v813_v6 = vsel %vm171_vm3, %v739_v50, %v799_v56  ;;  %v728_v11 = vpop.permute.xlu1 %727 }
 0x518   :  { %v752_v30 = vpop.permute.xlu0 %751 }
 0x519   :  { %v755_v35 = vsel %vm109_vm1, %v752_v30, %v754_v23  ;;  %v759_v36 = vsel %vm109_vm1, %v754_v23, %v752_v30  ;;  %v706_v23 = vpop.permute.xlu2 %705 }
 0x51a   :  { %v760_v37 = vmul.f32 %v755_v35, %v1157_v14  ;;  %v761_v39 = vmul.f32 %v759_v36, %v1160_v15  ;;  %v798_v15 = vrot.slane %v749_v42, 4 }
 0x51c   :  { %v882_v51 = vrot.slane %v760_v37, 4  ;;  %v883_v52 = vrot.slane %v761_v39, 4  ;;  %v812_v5 = vsel %vm171_vm3, %v738_v49, %v798_v15 }
 0x51f   :  { %v709_v0 = vpop.permute.xlu1 %708 }
 0x520   :  { %v765_v44 = vpop.permute.xlu0 %764  ;;  %v710_v26 = vsel %vm50_vm8, %v709_v0, %v706_v23  ;;  %v713_v27 = vsel %vm50_vm8, %v706_v23, %v709_v0 }
 0x521   :  { %v766_v4 = vsel %vm123_vm0, %v763_v1, %v765_v44  ;;  %v770_v47 = vsel %vm123_vm0, %v765_v44, %v763_v1  ;;  %v714_v35 = vmul.f32 %v713_v27, %v1243_v32 }
 0x522   :  { %v771_v55 = vmul.f32 %v766_v4, %v1147_v8  ;;  %v772_v14 = vmul.f32 %v770_v47, %v1150_v9  ;;  %v892_v8 = vsel %vm171_vm3, %v876_v59, %v749_v42  ;;  %v893_v9 = vsel %vm171_vm3, %v877_v40, %v750_v3 }
 0x523   :  { %v786_v3 = vrot.slane %v714_v35, 4 }
 0x524   :  { %v804_v45 = vrot.slane %v771_v55, 4  ;;  %v805_v57 = vrot.slane %v772_v14, 4  ;;  %v894_v46 = vsel %vm171_vm3, %v882_v51, %v771_v55  ;;  %v895_v58 = vsel %vm171_vm3, %v883_v52, %v772_v14 }
 0x525   :  { %912 = vmatpush.msra.mxu2 %v894_v46  ;;  %932 = vmatpush.msra.mxu3 %v895_v58 }
 0x526   :  { %v814_v41 = vsel %vm171_vm3, %v760_v37, %v804_v45  ;;  %v815_v60 = vsel %vm171_vm3, %v761_v39, %v805_v57 }
 0x527   :  { %834 = vmatpush.msra.mxu0 %v814_v41  ;;  %854 = vmatpush.msra.mxu1 %v815_v60 }
 0x528   :  { %913 = vmatpush.msra.mxu2 %v892_v8  ;;  %933 = vmatpush.msra.mxu3 %v893_v9  ;;  %v717_v61 = vpop.permute.xlu0 %716 }
 0x529   :  { %835 = vmatpush.msra.mxu0 %v812_v5  ;;  %855 = vmatpush.msra.mxu1 %v813_v6 }
 0x530   :  { %v720_v10 = vpop.permute.xlu0 %719 }
 0x531   :  { %v721_v62 = vsel %vm64_vm5, %v720_v10, %v717_v61  ;;  %v724_v7 = vsel %vm64_vm5, %v717_v61, %v720_v10 }
 0x532   :  { %v725_v1 = vmul.f32 %v724_v7, %v1207_v53  ;;  %v726_v22 = vmul.f32 %v721_v62, %v1210_v54 }
 0x534   :  { %v870_v31 = vrot.slane %v725_v1, 4  ;;  %v871_v34 = vrot.slane %v726_v22, 4 }
 0x538   :  { %v694_v13 = vpop.permute.xlu0 %693 }
 0x539   :  { %v699_v20 = vsel %vm36_vm7, %v698_v12, %v694_v13  ;;  %v702_v21 = vsel %vm36_vm7, %v694_v13, %v698_v12 }
 0x53a   :  { %v703_v24 = vmul.f32 %v702_v21, %v1229_v18  ;;  %v704_v25 = vmul.f32 %v699_v20, %v1232_v19  ;;  %v715_v18 = vmul.f32 %v710_v26, %v1246_v33 }
 0x53c   :  { %v864_v19 = vrot.slane %v703_v24, 4  ;;  %v865_v36 = vrot.slane %v704_v25, 4  ;;  %v808_v44 = vsel %vm171_vm3, %v703_v24, %v786_v3 }
 0x53e   :  { %v888_v32 = vsel %vm171_vm3, %v864_v19, %v714_v35  ;;  %v889_v33 = vsel %vm171_vm3, %v865_v36, %v715_v18 }
 0x540   :  { %v731_v28 = vpop.permute.xlu0 %730 }
 0x541   :  { %v732_v29 = vsel %vm78_vm6, %v731_v28, %v728_v11  ;;  %v735_v30 = vsel %vm78_vm6, %v728_v11, %v731_v28 }
 0x542   :  { %v736_v53 = vmul.f32 %v735_v30, %v1219_v63  ;;  %v737_v54 = vmul.f32 %v732_v29, %v1222_v2  ;;  %v787_v2 = vrot.slane %v715_v18, 4 }
 0x544   :  { %v792_v16 = vrot.slane %v736_v53, 4  ;;  %v793_v17 = vrot.slane %v737_v54, 4  ;;  %v890_v37 = vsel %vm171_vm3, %v870_v31, %v736_v53  ;;  %v891_v39 = vsel %vm171_vm3, %v871_v34, %v737_v54 }
 0x545   :  { %914 = vmatpush.msra.mxu2 %v890_v37  ;;  %934 = vmatpush.msra.mxu3 %v891_v39  ;;  %v809_v4 = vsel %vm171_vm3, %v704_v25, %v787_v2 }
 0x546   :  { %v810_v42 = vsel %vm171_vm3, %v725_v1, %v792_v16  ;;  %v811_v63 = vsel %vm171_vm3, %v726_v22, %v793_v17 }
 0x547   :  { %836 = vmatpush.msra.mxu0 %v810_v42  ;;  %856 = vmatpush.msra.mxu1 %v811_v63 }
 0x548   :  { %915 = vmatpush.msra.mxu2 %v888_v32  ;;  %935 = vmatpush.msra.mxu3 %v889_v33 }
 0x549   :  { %1033 = vmatmul.msk.f32.vlgmr.msra.gmra.mxu2 %vm180_vm9, %v1259_v48  ;;  %1035 = vmatmul.msk.f32.vlgmr.msra.gmra.mxu3 %vm180_vm9, %v1259_v48 }
 0x54a   :  { %837 = vmatpush.msra.mxu0 %v808_v44  ;;  %857 = vmatpush.msra.mxu1 %v809_v4 }
 0x54b   :  { %1029 = vmatmul.msk.f32.vlgmr.msra.gmra.mxu0 %vm180_vm9, %v1259_v48  ;;  %1031 = vmatmul.msk.f32.vlgmr.msra.gmra.mxu1 %vm180_vm9, %v1259_v48 }
 0x5c8   :  { %v839_v47 = vpop.f32.mrf.mxu0  ;;  %v859_v49 = vpop.f32.mrf.mxu1 }
 0x5cc   :  { %v917_v50 = vpop.f32.mrf.mxu2  ;;  %v937_v51 = vpop.f32.mrf.mxu3 }
 0x5cd   :  { %v942_v52 = vrot.slane %v917_v50, 4  ;;  %v943_v55 = vrot.slane %v937_v51, 4 }
 0x5cf   :  { %v946_v14 = vsel %vm171_vm3, %v839_v47, %v942_v52  ;;  %v947_v15 = vsel %vm171_vm3, %v859_v49, %v943_v55 }
 0x5d0   :  { %v948_v56 = vadd.f32 %v947_v15, %v946_v14  ;;  %v951_v45 = vmul.f32 %v946_v14, %v946_v14  ;;  %v952_v57 = vmul.f32 %v947_v15, %v947_v15 }
 0x5d2   :  { %949 = vadd.xlane.f32.xlu0 %v948_v56  ;;  %v953_v46 = vadd.f32 %v952_v57, %v951_v45 }
 0x5d4   :  { %954 = vadd.xlane.f32.xlu2 %v953_v46 }
 0x645   :  { %v950_v58 = vpop.xlane.xlu0 %949 }
 0x646   :  { %v957_v59 = vrot.slane %v950_v58, 4 }
 0x647   :  { %v955_v40 = vpop.xlane.xlu2 %954 }
 0x648   :  { %v959_v48 = vadd.f32 %v957_v59, %v950_v58  ;;  %v961_v41 = vrot.slane %v955_v40, 4 }
 0x64a   :  { %v964_v60 = vmul.f32 0.001953125, %v959_v48  ;;  %v963_v8 = vadd.f32 %v961_v41, %v955_v40 }
 0x64c   :  { %v966_v9 = vmul.f32 %v964_v60, %v964_v60  ;;  %v965_v61 = vmul.f32 0.001953125, %v963_v8 }
 0x64e   :  { %v967_v5 = vsub.f32 %v965_v61, %v966_v9 }
 0x650   :  { %v968_v6 = vadd.f32 1e-05, %v967_v5 }
 0x652   :  { %1053 = vrsqrt.f32 %v968_v6  ;;  %vm975_vm1 = vweird.f32 %v968_v6 }
 0x658   :  { %v1054_v10 = vpop.eup %1053 }
 0x659   :  { %v970_v11 = vmul.f32 %v1054_v10, %v968_v6  ;;  %vm976_vm0 = vweird.f32 %v1054_v10 }
 0x65a   :  { %vm977_vm2 = vmor %vm975_vm1, %vm976_vm0 }
 0x65b   :  { %v971_v12 = vmul.f32 %v1054_v10, %v970_v11 }
 0x65d   :  { %v972_v13 = vmul.f32 0.5, %v971_v12 }
 0x65f   :  { %v973_v62 = vsub.f32 1.5, %v972_v13 }
 0x661   :  { %v974_v7 = vmul.f32 %v1054_v10, %v973_v62 }
 0x663   :  { %v978_v20 = vsel %vm977_vm2, %v1054_v10, %v974_v7 }
 0x664   :  { %v979_v21 = vmul.f32 %v978_v20, %v1278_v38 }
 0x666   :  { %v983_v0 = vrot.slane %v979_v21, 4  ;;  %v980_v1 = vmul.f32 %v979_v21, %v964_v60 }
 0x668   :  { %v985_v22 = vsel %vm171_vm3, %v979_v21, %v983_v0  ;;  %v981_v23 = vsub.f32 %v1284_v43, %v980_v1 }
 0x669   :  { %992 = vperm.xlu1 %1046, %v985_v22  }
 0x66a   :  { %v987_v24 = vrot.slane %v981_v23, 4 }
 0x66c   :  { %v989_v25 = vsel %vm171_vm3, %v981_v23, %v987_v24 }
 0x671   :  { %999 = vperm.xlu1 %1046, %v989_v25  }
 0x6db   :  { %v993_v26 = vpop.permute.xlu1 %992 }
 0x6dc   :  { %v995_v27 = vmul.f32 %v993_v26, %v946_v14  ;;  %v996_v28 = vmul.f32 %v993_v26, %v947_v15 }
 0x6e3   :  { %v1000_v29 = vpop.permute.xlu1 %999 }
 0x6e4   :  { %v1002_v30 = vadd.f32 %v1000_v29, %v995_v27  ;;  %v1003_v31 = vadd.f32 %v1000_v29, %v996_v28 }
 0x6e6   :  { %v1004_v34 = vmax.f32 %v1002_v30, 0.0  ;;  %v1005_v53 = vmax.f32 %v1003_v31, 0.0 }
 0x6e8   :  { %1006 = vst [vmem:[%s1472_s5] sm:$0xff] %v1004_v34 }
 0x6e9   :  { %1007 = vst [vmem:[%s1472_s5 + $0x8] sm:$0xff] %v1005_v53 }

</bundles_post_ra>
